<compile_context>
chip_gen: v7x
topology: tpu7x:2x2x1
jax: 0.10.0
libtpu: 0.0.40
codegen_flags: <defaults>
</compile_context>

<pallas_src>
import jax
import jax.numpy as jnp
from jax.experimental import pallas as pl
from jax.experimental.pallas import tpu as pltpu

N_CLASSES = 10
N_PAD = 128  # lane-dense fc3 / output width


def mlp_kernel(x_ref, w1_ref, b1_ref, w2_ref, b2_ref, w3_ref, b3_ref, o_ref):
    # f32 -> bf16 cast fused into the kernel (x comes straight from HBM as f32).
    x = x_ref[...].astype(jnp.bfloat16)

    # fc1 + relu   (dropout is identity in eval mode)
    h1 = jnp.dot(x, w1_ref[...], preferred_element_type=jnp.float32)
    h1 = jnp.maximum(h1 + b1_ref[...], 0.0)

    # fc2 + relu
    h2 = jnp.dot(h1.astype(jnp.bfloat16), w2_ref[...],
                 preferred_element_type=jnp.float32)
    h2 = jnp.maximum(h2 + b2_ref[...], 0.0)

    # fc3 (lane-padded to 128 outputs; pad columns of w3/b3 are zeros)
    logits = jnp.dot(h2.astype(jnp.bfloat16), w3_ref[...],
                     preferred_element_type=jnp.float32)
    logits = logits + b3_ref[...]

    # Mask padded lanes to a large negative so they contribute ~0 to the softmax.
    # (-1e30 is safe in f32: exp underflows to exactly 0.)
    lane = jax.lax.broadcasted_iota(jnp.int32, logits.shape, dimension=1)
    logits = jnp.where(lane < N_CLASSES, logits, jnp.float32(-1e30))

    # log_softmax over dim=1 (numerically stable)
    m = jnp.max(logits, axis=1, keepdims=True)
    z = logits - m
    lse = jnp.log(jnp.sum(jnp.exp(z), axis=1, keepdims=True))
    o_ref[...] = z - lse


def prepare_params(params):
    """One-time repack: weights -> bf16, fc3 padded to 128 lanes (lane-dense)."""
    w1, b1, w2, b2, w3, b3 = params
    w3p = jnp.zeros((w3.shape[0], N_PAD), jnp.float32).at[:, :N_CLASSES].set(w3)
    b3p = jnp.zeros((1, N_PAD), jnp.float32).at[:, :N_CLASSES].set(b3)
    return (w1.astype(jnp.bfloat16), b1.astype(jnp.float32),
            w2.astype(jnp.bfloat16), b2.astype(jnp.float32),
            w3p.astype(jnp.bfloat16), b3p.astype(jnp.float32))


def _pick_tm(B):
    """Batch tile: as large as possible (amortize per-grid-step overhead), but
    keep >= 2 grid steps whenever B > 128 so the 'parallel' batch axis can
    shard across v7x's two TensorCores.  Capped at 1024 so the working set
    stays inside the default scoped VMEM on v5e/v6e/v7x (no flags needed)."""
    if B <= 128:
        return 128
    for tm in (1024, 512, 256, 128):
        if pl.cdiv(B, tm) >= 2:
            return tm
    return 128


def _resident_spec(shape):
    """Constant index_map -> block is DMA'd once and stays VMEM-resident.
    Single-buffered: double-buffering a never-changing block is wasted VMEM."""
    idx = lambda i: (0,) * len(shape)
    try:
        return pl.BlockSpec(shape, idx, pipeline_mode=pl.Buffered(1))
    except TypeError:  # older JAX without pipeline_mode on BlockSpec
        return pl.BlockSpec(shape, idx)


@jax.jit
def mlp_forward(x_nchw, prepped):
    w1, b1, w2, b2, w3p, b3p = prepped
    B = x_nchw.shape[0]
    # Glue reshape only; the f32 -> bf16 cast is fused into the kernel.
    x = x_nchw.reshape(B, 28 * 28)

    TM = _pick_tm(B)
    B_pad = TM * pl.cdiv(B, TM)
    if B_pad != B:  # pad only when the batch is ragged w.r.t. the tile
        x = jnp.pad(x, ((0, B_pad - B), (0, 0)))

    out_padded = pl.pallas_call(
        mlp_kernel,
        out_shape=jax.ShapeDtypeStruct((B_pad, N_PAD), jnp.float32),
        grid=(B_pad // TM,),
        in_specs=[
            pl.BlockSpec((TM, 28 * 28), lambda i: (i, 0)),  # x: batch-tiled, K whole
            _resident_spec(w1.shape), _resident_spec(b1.shape),
            _resident_spec(w2.shape), _resident_spec(b2.shape),
            _resident_spec(w3p.shape), _resident_spec(b3p.shape),
        ],
        out_specs=pl.BlockSpec((TM, N_PAD), lambda i: (i, 0)),
        compiler_params=pltpu.CompilerParams(
            dimension_semantics=("parallel",)),
    )(x, w1, b1, w2, b2, w3p, b3p)

    # Padded batch rows / padded class lanes are sliced off here; nothing inside
    # the kernel reduces over the batch axis, so garbage rows are harmless.
    return out_padded[:B, :N_CLASSES]


def init_params(key):
    # Deterministic synthetic params matching nn.Linear shapes.
    # Stored as (in, out); biases kept 2D (1, out) for TPU-friendly layout.
    k1, k2, k3, k4, k5, k6 = jax.random.split(key, 6)
    w1 = jax.random.normal(k1, (784, 512), jnp.float32) * 0.02
    b1 = jax.random.normal(k2, (1, 512), jnp.float32) * 0.02
    w2 = jax.random.normal(k3, (512, 256), jnp.float32) * 0.02
    b2 = jax.random.normal(k4, (1, 256), jnp.float32) * 0.02
    w3 = jax.random.normal(k5, (256, 10), jnp.float32) * 0.02
    b3 = jax.random.normal(k6, (1, 10), jnp.float32) * 0.02
    return (w1, b1, w2, b2, w3, b3)


if __name__ == "__main__":
    key = jax.random.PRNGKey(0)
    kx, kp = jax.random.split(key)
    B = 8
    x = jax.random.normal(kx, (B, 1, 28, 28), jnp.float32)  # NCHW like PyTorch
    params = init_params(kp)
    prepped = prepare_params(params)  # one-time bf16 repack, reused across calls

    out = mlp_forward(x, prepped)
    jax.block_until_ready(out)

    # Sanity check against a pure-JAX reference with the same bf16 dataflow.
    w1, b1, w2, b2, w3, b3 = params
    xf = x.reshape(B, 784).astype(jnp.bfloat16)
    h = jnp.dot(xf, w1.astype(jnp.bfloat16),
                preferred_element_type=jnp.float32) + b1
    h = jnp.maximum(h, 0.0)
    h = jnp.dot(h.astype(jnp.bfloat16), w2.astype(jnp.bfloat16),
                preferred_element_type=jnp.float32) + b2
    h = jnp.maximum(h, 0.0)
    logits = jnp.dot(h.astype(jnp.bfloat16), w3.astype(jnp.bfloat16),
                     preferred_element_type=jnp.float32) + b3
    ref = jax.nn.log_softmax(logits, axis=1)

    assert out.shape == (B, 10)
    assert jnp.allclose(out, ref, atol=5e-3, rtol=5e-3), (
        float(jnp.max(jnp.abs(out - ref))))

    print("KERNEL_OK")
</pallas_src>

<mosaic_0001>
module attributes {stable_mosaic.version = 11 : i64} {
  func.func @mlp_kernel(%arg0: i32, %arg1: memref<128x784xf32, #tpu.memory_space<vmem>>, %arg2: memref<784x512xbf16, #tpu.memory_space<vmem>>, %arg3: memref<1x512xf32, #tpu.memory_space<vmem>>, %arg4: memref<512x256xbf16, #tpu.memory_space<vmem>>, %arg5: memref<1x256xf32, #tpu.memory_space<vmem>>, %arg6: memref<256x128xbf16, #tpu.memory_space<vmem>>, %arg7: memref<1x128xf32, #tpu.memory_space<vmem>>, %arg8: memref<128x128xf32, #tpu.memory_space<vmem>>) attributes {dimension_semantics = [#tpu.dimension_semantics<parallel>], iteration_bounds = array<i64: 1>, scalar_prefetch = 0 : i64, scratch_operands = 0 : i64, tpu.core_type = #tpu.core_type<tc>, window_params = [{transform_indices = @transform_0, window_bounds = array<i64: 128, 784>}, {pipeline_mode = #tpu.pipeline_mode<synchronous>, transform_indices = @transform_1, window_bounds = array<i64: 784, 512>}, {pipeline_mode = #tpu.pipeline_mode<synchronous>, transform_indices = @transform_2, window_bounds = array<i64: 1, 512>}, {pipeline_mode = #tpu.pipeline_mode<synchronous>, transform_indices = @transform_3, window_bounds = array<i64: 512, 256>}, {pipeline_mode = #tpu.pipeline_mode<synchronous>, transform_indices = @transform_4, window_bounds = array<i64: 1, 256>}, {pipeline_mode = #tpu.pipeline_mode<synchronous>, transform_indices = @transform_5, window_bounds = array<i64: 256, 128>}, {pipeline_mode = #tpu.pipeline_mode<synchronous>, transform_indices = @transform_6, window_bounds = array<i64: 1, 128>}, {transform_indices = @transform_7, window_bounds = array<i64: 128, 128>}]} {
    %c0 = arith.constant 0 : index
    %c0_0 = arith.constant 0 : index
    %0 = vector.load %arg1[%c0, %c0_0] : memref<128x784xf32, #tpu.memory_space<vmem>>, vector<128x784xf32>
    %1 = arith.truncf %0 : vector<128x784xf32> to vector<128x784xbf16>
    %c0_1 = arith.constant 0 : index
    %c0_2 = arith.constant 0 : index
    %2 = vector.load %arg2[%c0_1, %c0_2] : memref<784x512xbf16, #tpu.memory_space<vmem>>, vector<784x512xbf16>
    %cst = arith.constant dense<0.000000e+00> : vector<128x512xf32>
    %3 = tpu.matmul %1, %2, %cst {dimension_numbers = #tpu.dot_dimension_numbers<[1], [0], [0], [1], [0, 0, 1, 1], [], []>} : vector<128x784xbf16>, vector<784x512xbf16>, vector<128x512xf32> -> vector<128x512xf32>
    %c0_3 = arith.constant 0 : index
    %c0_4 = arith.constant 0 : index
    %4 = vector.load %arg3[%c0_3, %c0_4] : memref<1x512xf32, #tpu.memory_space<vmem>>, vector<1x512xf32>
    %5 = vector.broadcast %4 : vector<1x512xf32> to vector<128x512xf32>
    %6 = arith.addf %3, %5 : vector<128x512xf32>
    %cst_5 = arith.constant 0.000000e+00 : f32
    %7 = vector.broadcast %cst_5 : f32 to vector<128x512xf32>
    %8 = arith.maximumf %6, %7 : vector<128x512xf32>
    %9 = arith.truncf %8 : vector<128x512xf32> to vector<128x512xbf16>
    %c0_6 = arith.constant 0 : index
    %c0_7 = arith.constant 0 : index
    %10 = vector.load %arg4[%c0_6, %c0_7] : memref<512x256xbf16, #tpu.memory_space<vmem>>, vector<512x256xbf16>
    %cst_8 = arith.constant dense<0.000000e+00> : vector<128x256xf32>
    %11 = tpu.matmul %9, %10, %cst_8 {dimension_numbers = #tpu.dot_dimension_numbers<[1], [0], [0], [1], [0, 0, 1, 1], [], []>} : vector<128x512xbf16>, vector<512x256xbf16>, vector<128x256xf32> -> vector<128x256xf32>
    %c0_9 = arith.constant 0 : index
    %c0_10 = arith.constant 0 : index
    %12 = vector.load %arg5[%c0_9, %c0_10] : memref<1x256xf32, #tpu.memory_space<vmem>>, vector<1x256xf32>
    %13 = vector.broadcast %12 : vector<1x256xf32> to vector<128x256xf32>
    %14 = arith.addf %11, %13 : vector<128x256xf32>
    %cst_11 = arith.constant 0.000000e+00 : f32
    %15 = vector.broadcast %cst_11 : f32 to vector<128x256xf32>
    %16 = arith.maximumf %14, %15 : vector<128x256xf32>
    %17 = arith.truncf %16 : vector<128x256xf32> to vector<128x256xbf16>
    %c0_12 = arith.constant 0 : index
    %c0_13 = arith.constant 0 : index
    %18 = vector.load %arg6[%c0_12, %c0_13] : memref<256x128xbf16, #tpu.memory_space<vmem>>, vector<256x128xbf16>
    %cst_14 = arith.constant dense<0.000000e+00> : vector<128x128xf32>
    %19 = tpu.matmul %17, %18, %cst_14 {dimension_numbers = #tpu.dot_dimension_numbers<[1], [0], [0], [1], [0, 0, 1, 1], [], []>} : vector<128x256xbf16>, vector<256x128xbf16>, vector<128x128xf32> -> vector<128x128xf32>
    %c0_15 = arith.constant 0 : index
    %c0_16 = arith.constant 0 : index
    %20 = vector.load %arg7[%c0_15, %c0_16] : memref<1x128xf32, #tpu.memory_space<vmem>>, vector<1x128xf32>
    %21 = vector.broadcast %20 : vector<1x128xf32> to vector<128x128xf32>
    %22 = arith.addf %19, %21 : vector<128x128xf32>
    %23 = tpu.iota {dimensions = array<i32: 1>} : vector<128x128xi32>
    %c10_i32 = arith.constant 10 : i32
    %24 = vector.broadcast %c10_i32 : i32 to vector<128x128xi32>
    %25 = arith.cmpi slt, %23, %24 : vector<128x128xi32>
    %cst_17 = arith.constant -1.000000e+30 : f32
    %26 = vector.broadcast %cst_17 : f32 to vector<128x128xf32>
    %27 = arith.select %25, %22, %26 : vector<128x128xi1>, vector<128x128xf32>
    %cst_18 = arith.constant dense<0xFF800000> : vector<128xf32>
    %28 = vector.multi_reduction <maximumf>, %27, %cst_18 [1] : vector<128x128xf32> to vector<128xf32>
    %29 = vector.shape_cast %28 : vector<128xf32> to vector<128x1xf32>
    %30 = vector.broadcast %29 : vector<128x1xf32> to vector<128x128xf32>
    %31 = arith.subf %27, %30 : vector<128x128xf32>
    %32 = math.exp %31 : vector<128x128xf32>
    %cst_19 = arith.constant dense<0.000000e+00> : vector<128xf32>
    %33 = vector.multi_reduction <add>, %32, %cst_19 [1] : vector<128x128xf32> to vector<128xf32>
    %34 = vector.shape_cast %33 : vector<128xf32> to vector<128x1xf32>
    %35 = math.log %34 : vector<128x1xf32>
    %36 = vector.broadcast %35 : vector<128x1xf32> to vector<128x128xf32>
    %37 = arith.subf %31, %36 : vector<128x128xf32>
    %c0_20 = arith.constant 0 : index
    %c0_21 = arith.constant 0 : index
    %38 = vector.load %arg8[%c0_20, %c0_21] : memref<128x128xf32, #tpu.memory_space<vmem>>, vector<128x128xf32>
    tpu.vector_store %arg8[%c0_20, %c0_21], %37 {strides = array<i32>} : memref<128x128xf32, #tpu.memory_space<vmem>>, vector<128x128xf32>,
    return
  }
  func.func @transform_0(%arg0: i32) -> (i32, i32) {
    %c0_i32 = arith.constant 0 : i32
    %c0_i32_0 = arith.constant 0 : i32
    return %arg0, %c0_i32 : i32, i32
  }
  func.func @transform_1(%arg0: i32) -> (i32, i32) {
    %c0_i32 = arith.constant 0 : i32
    %c0_i32_0 = arith.constant 0 : i32
    %c0_i32_1 = arith.constant 0 : i32
    return %c0_i32, %c0_i32_0 : i32, i32
  }
  func.func @transform_2(%arg0: i32) -> (i32, i32) {
    %c0_i32 = arith.constant 0 : i32
    %c0_i32_0 = arith.constant 0 : i32
    %c0_i32_1 = arith.constant 0 : i32
    return %c0_i32, %c0_i32_0 : i32, i32
  }
  func.func @transform_3(%arg0: i32) -> (i32, i32) {
    %c0_i32 = arith.constant 0 : i32
    %c0_i32_0 = arith.constant 0 : i32
    %c0_i32_1 = arith.constant 0 : i32
    return %c0_i32, %c0_i32_0 : i32, i32
  }
  func.func @transform_4(%arg0: i32) -> (i32, i32) {
    %c0_i32 = arith.constant 0 : i32
    %c0_i32_0 = arith.constant 0 : i32
    %c0_i32_1 = arith.constant 0 : i32
    return %c0_i32, %c0_i32_0 : i32, i32
  }
  func.func @transform_5(%arg0: i32) -> (i32, i32) {
    %c0_i32 = arith.constant 0 : i32
    %c0_i32_0 = arith.constant 0 : i32
    %c0_i32_1 = arith.constant 0 : i32
    return %c0_i32, %c0_i32_0 : i32, i32
  }
  func.func @transform_6(%arg0: i32) -> (i32, i32) {
    %c0_i32 = arith.constant 0 : i32
    %c0_i32_0 = arith.constant 0 : i32
    %c0_i32_1 = arith.constant 0 : i32
    return %c0_i32, %c0_i32_0 : i32, i32
  }
  func.func @transform_7(%arg0: i32) -> (i32, i32) {
    %c0_i32 = arith.constant 0 : i32
    %c0_i32_0 = arith.constant 0 : i32
    return %arg0, %c0_i32 : i32, i32
  }
}

</mosaic_0001>

<bundles_post_ra>
// kernel: mlp_forward.1
= control target key start
LH: loop header
LB: loop body
LE: loop exit
PB: predicated region body
PF: predicated region fallthrough
CT: control target
= control target key end

     0   :  { %12 = vsyncpa [#allocation3], 0  ;;  %s4709_s24 = smov [#allocation2]   ;;  %s6265_s0 = inlined_call_operand.vmem [shape: f32[128,784], index: 0, kind: input, shape index: {}]   ;;  %s6266_s1 = inlined_call_operand.vmem [shape: bf16[784,512], index: 1, kind: input, shape index: {}]   ;;  %s6267_s2 = inlined_call_operand.vmem [shape: f32[1,512], index: 2, kind: input, shape index: {}]   ;;  %s6268_s3 = inlined_call_operand.hbm [shape: bf16[512,256], index: 3, kind: input, shape index: {}]   ;;  %s6269_s4 = inlined_call_operand.vmem [shape: f32[1,256], index: 4, kind: input, shape index: {}]   ;;  %s6270_s5 = inlined_call_operand.vmem [shape: bf16[256,128], index: 5, kind: input, shape index: {}]   ;;  %s6271_s6 = inlined_call_operand.vmem [shape: f32[1,128], index: 6, kind: input, shape index: {}]   ;;  %s6272_s7 = inlined_call_operand.vmem [shape: f32[128,128], index: 7, kind: output, shape index: {}]  }
   0x1   :  { %s24_s25 = sshll.u32 %s4709_s24, 4  ;;  %s4685_s28 = scalar_lea.hbm %s6268_s3, 8192  ;;  %s25_s25 = int_to_ptr.vmem [resolvable:$true] %s24_s25 }
   0x2   :  { %p4686_p0 = scmp.ne.s32.totalorder %s6268_s3, %s4685_s28  ;;  %p4689_p1 = scmp.lt.u32.totalorder %s4685_s28, %s6268_s3 }
   0x4   :  { %p4691_p2 = pnand %p4689_p1, %p4686_p0 }
   0x6   :  { %4694 = shalt.err (!%p4691_p2)
}
   0x7   :  { %s4695_s10 = scalar_lea.vmem %s25_s25, 8192  ;;  %p4700_p4 = scmp.lt.s32.totalorder %s25_s25, %s25_s25 }
   0x8   :  { %p4696_p3 = scmp.ne.s32.totalorder %s25_s25, %s4695_s10  ;;  %p4701_p5 = scmp.lt.s32.totalorder %s4695_s10, %s4695_s10 }
   0xa   :  { %p4702_p6 = por %p4701_p5, %p4700_p4 }
   0xc   :  { %p4703_p7 = pnand %p4702_p6, %p4696_p3 }
   0xe   :  { %4706 = shalt.err (!%p4703_p7)
}
   0xf   :  { %s4710_s11 = smov 128   ;;  %s4711_s12 = smov 8  }
  0x10   :  { %30 = dma.hbm_to_vmem [thread:$0]  %s6268_s3, 8192, %s25_s25, [#allocation3], %s4710_s11, %s4710_s11, %s4711_s12  }
  0x11   :  { %4707 = dma.done.wait [#allocation3], 8192  }
  0x12   :  { %4708 = vsyncadd [#allocation3], 4294959104  ;;  %v4712_v0 = vmov 0   ;;  %v4215_v1 = vld [vmem:[%s6266_s1 + $0x4] ss:$16 sps:$4 sm:$0xff]   ;;  %v54_v7 = vld [vmem:[%s6265_s0 + $0x68] sm:$0xff] }
  0x13   :  { %1803 = vmatprep.mubr.bf16.mxu1 %v4712_v0  ;;  %v4217_v2 = vld [vmem:[%s6266_s1 + $0x604] ss:$16 sps:$4 sm:$0xff]   ;;  %1432 = vmatprep.subr.bf16.mxu0 %v4215_v1  ;;  %v4219_v3 = vld [vmem:[%s6266_s1] ss:$16 sps:$4 sm:$0xff]   ;;  %vm1407_vm0 = vcmask 130048   ;;  %v68_v18 = vld [vmem:[%s6265_s0 + $0xd8] sm:$0xff] }
  0x14   :  { %v4220_v4 = vld [vmem:[%s6266_s1 + $0x600] ss:$16 sps:$4 sm:$0xff]   ;;  %1771 = vmatprep.subr.bf16.mxu1 %v4217_v2  ;;  %v4221_v5 = vld [vmem:[%s6266_s1 + $0x24] ss:$16 sps:$4 sm:$0xff]   ;;  %1433 = vmatpush1.bf16.msra.mxu0 %v4219_v3  ;;  %v4223_v9 = vld [vmem:[%s6266_s1 + $0x8] ss:$16 sps:$4 sm:$0xff]  }
  0x15   :  { %v47_v6 = vld [vmem:[%s6265_s0 + $0x30] sm:$0xff]  ;;  %1772 = vmatpush1.bf16.msra.mxu1 %v4220_v4  ;;  %1434 = vmatprep.subr.bf16.mxu0 %v4221_v5  ;;  %v4225_v10 = vld [vmem:[%s6266_s1 + $0xc] ss:$16 sps:$4 sm:$0xff]   ;;  %v4229_v13 = vld [vmem:[%s6266_s1 + $0x28] ss:$16 sps:$4 sm:$0xff]  }
  0x16   :  { %v4787_v8 = vpack.c.bf16 %v54_v7, %v47_v6  ;;  %v4226_v11 = vld [vmem:[%s6266_s1 + $0x20] ss:$16 sps:$4 sm:$0xff]   ;;  %v4227_v12 = vld [vmem:[%s6266_s1 + $0x44] ss:$16 sps:$4 sm:$0xff]   ;;  %1884 = vmatprep.subr.bf16.mxu1 %v4225_v10  ;;  %v4231_v14 = vld [vmem:[%s6266_s1 + $0x2c] ss:$16 sps:$4 sm:$0xff]  }
  0x17   :  { %v4232_v15 = vld [vmem:[%s6266_s1 + $0x40] ss:$16 sps:$4 sm:$0xff]   ;;  %v4233_v16 = vld [vmem:[%s6266_s1 + $0x64] ss:$16 sps:$4 sm:$0xff]   ;;  %v4235_v20 = vld [vmem:[%s6266_s1 + $0x48] ss:$16 sps:$4 sm:$0xff]  }
  0x18   :  { %3730 = vmatmul.mubr.msk.bf16.vlgmr.msra.gmra.mrb[0].mxu1 %vm1407_vm0, %v4787_v8  ;;  %1435 = vmatpush1.bf16.msra.mxu0 %v4226_v11  ;;  %v61_v17 = vld [vmem:[%s6265_s0 + $0xa0] sm:$0xff]  ;;  %v4237_v21 = vld [vmem:[%s6266_s1 + $0x4c] ss:$16 sps:$4 sm:$0xff]   ;;  %v4241_v24 = vld [vmem:[%s6266_s1 + $0x68] ss:$16 sps:$4 sm:$0xff]  }
  0x19   :  { %1885 = vmatpush1.bf16.msra.mxu1 %v4223_v9  ;;  %1436 = vmatprep.subr.bf16.mxu0 %v4227_v12  ;;  %v4822_v19 = vpack.c.bf16 %v68_v18, %v61_v17  ;;  %v4238_v22 = vld [vmem:[%s6266_s1 + $0x60] ss:$16 sps:$4 sm:$0xff]   ;;  %v4239_v23 = vld [vmem:[%s6266_s1 + $0x84] ss:$16 sps:$4 sm:$0xff]   ;;  %v4243_v25 = vld [vmem:[%s6266_s1 + $0x6c] ss:$16 sps:$4 sm:$0xff]  }
  0x1a   :  { %1813 = vmatprep.mubr.bf16.mxu1 %v4712_v0  ;;  %1886 = vmatprep.subr.bf16.mxu1 %v4231_v14  ;;  %v4244_v26 = vld [vmem:[%s6266_s1 + $0x80] ss:$16 sps:$4 sm:$0xff]   ;;  %v82_v28 = vld [vmem:[%s6265_s0 + $0x148] sm:$0xff]  ;;  %v4245_v29 = vld [vmem:[%s6266_s1 + $0xa4] ss:$16 sps:$4 sm:$0xff]  }
  0x1b   :  { %v75_v27 = vld [vmem:[%s6265_s0 + $0x110] sm:$0xff]  ;;  %v4249_v30 = vld [vmem:[%s6266_s1 + $0x8c] ss:$16 sps:$4 sm:$0xff]   ;;  %v4247_v32 = vld [vmem:[%s6266_s1 + $0x88] ss:$16 sps:$4 sm:$0xff]  }
  0x1c   :  { %1437 = vmatpush1.bf16.msra.mxu0 %v4232_v15  ;;  %v4860_v31 = vpack.c.bf16 %v82_v28, %v75_v27  ;;  %v4250_v33 = vld [vmem:[%s6266_s1 + $0xa0] ss:$16 sps:$4 sm:$0xff]   ;;  %v4251_v34 = vld [vmem:[%s6266_s1 + $0xc4] ss:$16 sps:$4 sm:$0xff]   ;;  %v4255_v35 = vld [vmem:[%s6266_s1 + $0xac] ss:$16 sps:$4 sm:$0xff]  }
  0x1d   :  { %1887 = vmatpush1.bf16.msra.mxu1 %v4229_v13  ;;  %1438 = vmatprep.subr.bf16.mxu0 %v4233_v16  ;;  %v4253_v36 = vld [vmem:[%s6266_s1 + $0xa8] ss:$16 sps:$4 sm:$0xff]   ;;  %v4256_v37 = vld [vmem:[%s6266_s1 + $0xc0] ss:$16 sps:$4 sm:$0xff]   ;;  %v4257_v38 = vld [vmem:[%s6266_s1 + $0xe4] ss:$16 sps:$4 sm:$0xff]  }
  0x1e   :  { %1888 = vmatprep.subr.bf16.mxu1 %v4237_v21  ;;  %v89_v39 = vld [vmem:[%s6265_s0 + $0x180] sm:$0xff]  ;;  %v96_v40 = vld [vmem:[%s6265_s0 + $0x1b8] sm:$0xff]  ;;  %v103_v49 = vld [vmem:[%s6265_s0 + $0x1f0] sm:$0xff] }
  0x1f   :  { %v4261_v41 = vld [vmem:[%s6266_s1 + $0xcc] ss:$16 sps:$4 sm:$0xff]   ;;  %v4895_v42 = vpack.c.bf16 %v96_v40, %v89_v39  ;;  %v4259_v43 = vld [vmem:[%s6266_s1 + $0xc8] ss:$16 sps:$4 sm:$0xff]   ;;  %v4262_v44 = vld [vmem:[%s6266_s1 + $0xe0] ss:$16 sps:$4 sm:$0xff]  }
  0x20   :  { %3731 = vmatmul.mubr.msk.bf16.gmra.mrb[4].mxu1 %vm1407_vm0, %v4822_v19  ;;  %1439 = vmatpush1.bf16.msra.mxu0 %v4238_v22  ;;  %v4263_v45 = vld [vmem:[%s6266_s1 + $0x104] ss:$16 sps:$4 sm:$0xff]   ;;  %v4267_v46 = vld [vmem:[%s6266_s1 + $0xec] ss:$16 sps:$4 sm:$0xff]   ;;  %v4265_v47 = vld [vmem:[%s6266_s1 + $0xe8] ss:$16 sps:$4 sm:$0xff]  }
  0x21   :  { %1889 = vmatpush1.bf16.msra.mxu1 %v4235_v20  ;;  %1440 = vmatprep.subr.bf16.mxu0 %v4239_v23  ;;  %v4268_v48 = vld [vmem:[%s6266_s1 + $0x100] ss:$16 sps:$4 sm:$0xff]   ;;  %v110_v50 = vld [vmem:[%s6265_s0 + $0x228] sm:$0xff]  ;;  %v4269_v51 = vld [vmem:[%s6266_s1 + $0x124] ss:$16 sps:$4 sm:$0xff]  }
  0x22   :  { %1890 = vmatprep.subr.bf16.mxu1 %v4243_v25  ;;  %1823 = vmatprep.mubr.bf16.mxu1 %v4712_v0  ;;  %v4273_v52 = vld [vmem:[%s6266_s1 + $0x10c] ss:$16 sps:$4 sm:$0xff]   ;;  %v4930_v53 = vpack.c.bf16 %v110_v50, %v103_v49  ;;  %v4271_v54 = vld [vmem:[%s6266_s1 + $0x108] ss:$16 sps:$4 sm:$0xff]   ;;  %v4274_v55 = vld [vmem:[%s6266_s1 + $0x120] ss:$16 sps:$4 sm:$0xff]  }
  0x23   :  { %v4275_v56 = vld [vmem:[%s6266_s1 + $0x144] ss:$16 sps:$4 sm:$0xff]   ;;  %v4279_v57 = vld [vmem:[%s6266_s1 + $0x12c] ss:$16 sps:$4 sm:$0xff]   ;;  %v4277_v58 = vld [vmem:[%s6266_s1 + $0x128] ss:$16 sps:$4 sm:$0xff]  }
  0x24   :  { %1441 = vmatpush1.bf16.msra.mxu0 %v4244_v26  ;;  %v4280_v59 = vld [vmem:[%s6266_s1 + $0x140] ss:$16 sps:$4 sm:$0xff]   ;;  %v124_v61 = vld [vmem:[%s6265_s0 + $0x298] sm:$0xff]  ;;  %v4281_v62 = vld [vmem:[%s6266_s1 + $0x164] ss:$16 sps:$4 sm:$0xff]  }
  0x25   :  { %1891 = vmatpush1.bf16.msra.mxu1 %v4241_v24  ;;  %1442 = vmatprep.subr.bf16.mxu0 %v4245_v29  ;;  %v117_v60 = vld [vmem:[%s6265_s0 + $0x260] sm:$0xff]  ;;  %v4285_v63 = vld [vmem:[%s6266_s1 + $0x14c] ss:$16 sps:$4 sm:$0xff]   ;;  %v4283_v2 = vld [vmem:[%s6266_s1 + $0x148] ss:$16 sps:$4 sm:$0xff]  }
  0x26   :  { %1892 = vmatprep.subr.bf16.mxu1 %v4249_v30  ;;  %v4965_v1 = vpack.c.bf16 %v124_v61, %v117_v60  ;;  %v4286_v3 = vld [vmem:[%s6266_s1 + $0x160] ss:$16 sps:$4 sm:$0xff]   ;;  %v4287_v4 = vld [vmem:[%s6266_s1 + $0x184] ss:$16 sps:$4 sm:$0xff]   ;;  %v4291_v5 = vld [vmem:[%s6266_s1 + $0x16c] ss:$16 sps:$4 sm:$0xff]  }
  0x27   :  { %v4289_v6 = vld [vmem:[%s6266_s1 + $0x168] ss:$16 sps:$4 sm:$0xff]   ;;  %v4292_v7 = vld [vmem:[%s6266_s1 + $0x180] ss:$16 sps:$4 sm:$0xff]   ;;  %v4293_v9 = vld [vmem:[%s6266_s1 + $0x1a4] ss:$16 sps:$4 sm:$0xff]  }
  0x28   :  { %3732 = vmatmul.mubr.msk.bf16.gmra.mrb[8].mxu1 %vm1407_vm0, %v4860_v31  ;;  %1443 = vmatpush1.bf16.msra.mxu0 %v4250_v33  ;;  %v131_v10 = vld [vmem:[%s6265_s0 + $0x2d0] sm:$0xff]  ;;  %v138_v11 = vld [vmem:[%s6265_s0 + $0x308] sm:$0xff]  ;;  %v49_v13 = vld [vmem:[%s6265_s0 + $0x40] sm:$0xff] }
  0x29   :  { %1893 = vmatpush1.bf16.msra.mxu1 %v4247_v32  ;;  %1444 = vmatprep.subr.bf16.mxu0 %v4251_v34  ;;  %v42_v12 = vld [vmem:[%s6265_s0 + $0x8] sm:$0xff]  ;;  %v5006_v16 = vpack.c.bf16 %v138_v11, %v131_v10  ;;  %v4298_v18 = vld [vmem:[%s6266_s1 + $0x1a0] ss:$16 sps:$4 sm:$0xff]   ;;  %v4299_v20 = vld [vmem:[%s6266_s1 + $0x1c4] ss:$16 sps:$4 sm:$0xff]  }
  0x2a   :  { %1894 = vmatprep.subr.bf16.mxu1 %v4255_v35  ;;  %1833 = vmatprep.mubr.bf16.mxu1 %v4712_v0  ;;  %v4297_v14 = vld [vmem:[%s6266_s1 + $0x18c] ss:$16 sps:$4 sm:$0xff]   ;;  %v154_v15 = vpack.c.bf16 %v49_v13, %v42_v12  ;;  %v4295_v17 = vld [vmem:[%s6266_s1 + $0x188] ss:$16 sps:$4 sm:$0xff]   ;;  %v4304_v23 = vld [vmem:[%s6266_s1 + $0x1c0] ss:$16 sps:$4 sm:$0xff]  }
  0x2b   :  { %v4303_v21 = vld [vmem:[%s6266_s1 + $0x1ac] ss:$16 sps:$4 sm:$0xff]   ;;  %v4301_v22 = vld [vmem:[%s6266_s1 + $0x1a8] ss:$16 sps:$4 sm:$0xff]   ;;  %v4305_v24 = vld [vmem:[%s6266_s1 + $0x1e4] ss:$16 sps:$4 sm:$0xff]  }
  0x2c   :  { %1445 = vmatpush1.bf16.msra.mxu0 %v4256_v37  ;;  %1464 = vmatprep.mubr.bf16.mxu0 %v154_v15  ;;  %v145_v25 = vld [vmem:[%s6265_s0 + $0x340] sm:$0xff]  ;;  %v152_v26 = vld [vmem:[%s6265_s0 + $0x378] sm:$0xff]  ;;  %v63_v40 = vld [vmem:[%s6265_s0 + $0xb0] sm:$0xff] }
  0x2d   :  { %1895 = vmatpush1.bf16.msra.mxu1 %v4253_v36  ;;  %1446 = vmatprep.subr.bf16.mxu0 %v4257_v38  ;;  %v4309_v27 = vld [vmem:[%s6266_s1 + $0x1cc] ss:$16 sps:$4 sm:$0xff]   ;;  %v4307_v28 = vld [vmem:[%s6266_s1 + $0x1c8] ss:$16 sps:$4 sm:$0xff]   ;;  %v5044_v29 = vpack.c.bf16 %v152_v26, %v145_v25  ;;  %v4310_v30 = vld [vmem:[%s6266_s1 + $0x1e0] ss:$16 sps:$4 sm:$0xff]  }
  0x2e   :  { %1896 = vmatprep.subr.bf16.mxu1 %v4261_v41  ;;  %v41_v32 = vld [vmem:[%s6265_s0] sm:$0xff]  ;;  %v48_v33 = vld [vmem:[%s6265_s0 + $0x38] sm:$0xff] }
  0x2f   :  { %v4313_v34 = vld [vmem:[%s6266_s1 + $0x204] ss:$16 sps:$4 sm:$0xff]   ;;  %v4316_v35 = vld [vmem:[%s6266_s1 + $0x1ec] ss:$16 sps:$4 sm:$0xff]   ;;  %v4311_v36 = vld [vmem:[%s6266_s1 + $0x200] ss:$16 sps:$4 sm:$0xff]   ;;  %v153_v38 = vpack.c.bf16 %v48_v33, %v41_v32 }
  0x30   :  { %3733 = vmatmul.mubr.msk.bf16.gmra.mrb[12].mxu1 %vm1407_vm0, %v4895_v42  ;;  %1447 = vmatpush1.bf16.msra.mxu0 %v4262_v44  ;;  %v4314_v37 = vld [vmem:[%s6266_s1 + $0x1e8] ss:$16 sps:$4 sm:$0xff]   ;;  %v4319_v41 = vld [vmem:[%s6266_s1 + $0x224] ss:$16 sps:$4 sm:$0xff]   ;;  %v4328_v50 = vld [vmem:[%s6266_s1 + $0x22c] ss:$16 sps:$4 sm:$0xff]  }
  0x31   :  { %1897 = vmatpush1.bf16.msra.mxu1 %v4259_v43  ;;  %1448 = vmatprep.subr.bf16.mxu0 %v4263_v45  ;;  %v56_v39 = vld [vmem:[%s6265_s0 + $0x78] sm:$0xff]  ;;  %v4317_v45 = vld [vmem:[%s6266_s1 + $0x220] ss:$16 sps:$4 sm:$0xff]   ;;  %v4325_v49 = vld [vmem:[%s6266_s1 + $0x244] ss:$16 sps:$4 sm:$0xff]  }
  0x32   :  { %1898 = vmatprep.subr.bf16.mxu1 %v4267_v46  ;;  %1843 = vmatprep.mubr.bf16.mxu1 %v4712_v0  ;;  %v4322_v43 = vld [vmem:[%s6266_s1 + $0x20c] ss:$16 sps:$4 sm:$0xff]   ;;  %v161_v44 = vpack.c.bf16 %v63_v40, %v56_v39  ;;  %v4320_v46 = vld [vmem:[%s6266_s1 + $0x208] ss:$16 sps:$4 sm:$0xff]   ;;  %v4343_v10 = vld [vmem:[%s6266_s1 + $0x2a4] ss:$16 sps:$4 sm:$0xff]  }
  0x33   :  { %v4332_v61 = vld [vmem:[%s6266_s1 + $0x248] ss:$16 sps:$4 sm:$0xff]   ;;  %v4346_v11 = vld [vmem:[%s6266_s1 + $0x28c] ss:$16 sps:$4 sm:$0xff]   ;;  %v4341_v12 = vld [vmem:[%s6266_s1 + $0x2a0] ss:$16 sps:$4 sm:$0xff]  }
  0x34   :  { %1449 = vmatpush1.bf16.msra.mxu0 %v4268_v48  ;;  %v62_v48 = vld [vmem:[%s6265_s0 + $0xa8] sm:$0xff]  ;;  %v4355_v26 = vld [vmem:[%s6266_s1 + $0x2e4] ss:$16 sps:$4 sm:$0xff]   ;;  %v112_v40 = vld [vmem:[%s6265_s0 + $0x238] sm:$0xff] }
  0x35   :  { %1899 = vmatpush1.bf16.msra.mxu1 %v4265_v47  ;;  %1450 = vmatprep.subr.bf16.mxu0 %v4269_v51  ;;  %v55_v47 = vld [vmem:[%s6265_s0 + $0x70] sm:$0xff]  ;;  %v4344_v13 = vld [vmem:[%s6266_s1 + $0x288] ss:$16 sps:$4 sm:$0xff]   ;;  %v97_v33 = vld [vmem:[%s6265_s0 + $0x1c0] sm:$0xff] }
  0x36   :  { %1900 = vmatprep.subr.bf16.mxu1 %v4273_v52  ;;  %v4323_v51 = vld [vmem:[%s6266_s1 + $0x240] ss:$16 sps:$4 sm:$0xff]   ;;  %v4326_v52 = vld [vmem:[%s6266_s1 + $0x228] ss:$16 sps:$4 sm:$0xff]  }
  0x37   :  { %v4350_v25 = vld [vmem:[%s6266_s1 + $0x2a8] ss:$16 sps:$4 sm:$0xff]  }
  0x38   :  { %3734 = vmatmul.mubr.msk.bf16.gmra.mrb[16].mxu1 %vm1407_vm0, %v4930_v53  ;;  %1451 = vmatpush1.bf16.msra.mxu0 %v4274_v55  ;;  %v70_v55 = vld [vmem:[%s6265_s0 + $0xe8] sm:$0xff] }
  0x39   :  { %1901 = vmatpush1.bf16.msra.mxu1 %v4271_v54  ;;  %1452 = vmatprep.subr.bf16.mxu0 %v4275_v56  ;;  %v160_v54 = vpack.c.bf16 %v62_v48, %v55_v47  ;;  %v77_v56 = vld [vmem:[%s6265_s0 + $0x120] sm:$0xff]  ;;  %v4362_v39 = vld [vmem:[%s6266_s1 + $0x2e8] ss:$16 sps:$4 sm:$0xff]   ;;  %v111_v48 = vld [vmem:[%s6265_s0 + $0x230] sm:$0xff] }
  0x3a   :  { %1902 = vmatprep.subr.bf16.mxu1 %v4279_v57  ;;  %1853 = vmatprep.mubr.bf16.mxu1 %v4712_v0  ;;  %v4331_v57 = vld [vmem:[%s6266_s1 + $0x264] ss:$16 sps:$4 sm:$0xff]   ;;  %v168_v60 = vpack.c.bf16 %v77_v56, %v70_v55  ;;  %v4368_v47 = vld [vmem:[%s6266_s1 + $0x308] ss:$16 sps:$4 sm:$0xff]  }
  0x3b   :  { %v126_v56 = vld [vmem:[%s6265_s0 + $0x2a8] sm:$0xff] }
  0x3c   :  { %1453 = vmatpush1.bf16.msra.mxu0 %v4280_v59  ;;  %v4329_v59 = vld [vmem:[%s6266_s1 + $0x260] ss:$16 sps:$4 sm:$0xff]  }
  0x3d   :  { %1903 = vmatpush1.bf16.msra.mxu1 %v4277_v58  ;;  %1454 = vmatprep.subr.bf16.mxu0 %v4281_v62  ;;  %v4334_v58 = vld [vmem:[%s6266_s1 + $0x24c] ss:$16 sps:$4 sm:$0xff]   ;;  %v69_v62 = vld [vmem:[%s6265_s0 + $0xe0] sm:$0xff] }
  0x3e   :  { %1904 = vmatprep.subr.bf16.mxu1 %v4285_v63  ;;  %v76_v63 = vld [vmem:[%s6265_s0 + $0x118] sm:$0xff] }
  0x40   :  { %3735 = vmatmul.mubr.msk.bf16.gmra.mrb[20].mxu1 %vm1407_vm0, %v4965_v1  ;;  %1455 = vmatpush1.bf16.msra.mxu0 %v4286_v3  ;;  %v4340_v3 = vld [vmem:[%s6266_s1 + $0x26c] ss:$16 sps:$4 sm:$0xff]  }
  0x41   :  { %1905 = vmatpush1.bf16.msra.mxu1 %v4283_v2  ;;  %1456 = vmatprep.subr.bf16.mxu0 %v4287_v4  ;;  %v4337_v2 = vld [vmem:[%s6266_s1 + $0x284] ss:$16 sps:$4 sm:$0xff]   ;;  %v4335_v4 = vld [vmem:[%s6266_s1 + $0x280] ss:$16 sps:$4 sm:$0xff]  }
  0x42   :  { %1906 = vmatprep.subr.bf16.mxu1 %v4291_v5  ;;  %1863 = vmatprep.mubr.bf16.mxu1 %v4712_v0  ;;  %v167_v5 = vpack.c.bf16 %v76_v63, %v69_v62  ;;  %v4380_v62 = vld [vmem:[%s6266_s1 + $0x348] ss:$16 sps:$4 sm:$0xff]   ;;  %v125_v63 = vld [vmem:[%s6265_s0 + $0x2a0] sm:$0xff] }
  0x44   :  { %1457 = vmatpush1.bf16.msra.mxu0 %v4292_v7  ;;  %v91_v7 = vld [vmem:[%s6265_s0 + $0x190] sm:$0xff] }
  0x45   :  { %1907 = vmatpush1.bf16.msra.mxu1 %v4289_v6  ;;  %1458 = vmatprep.subr.bf16.mxu0 %v4293_v9  ;;  %v84_v6 = vld [vmem:[%s6265_s0 + $0x158] sm:$0xff] }
  0x46   :  { %1908 = vmatprep.subr.bf16.mxu1 %v4297_v14  ;;  %v4338_v9 = vld [vmem:[%s6266_s1 + $0x268] ss:$16 sps:$4 sm:$0xff]   ;;  %v175_v14 = vpack.c.bf16 %v91_v7, %v84_v6 }
  0x47   :  { %v4386_v6 = vld [vmem:[%s6266_s1 + $0x368] ss:$16 sps:$4 sm:$0xff]  }
  0x48   :  { %3736 = vmatmul.mubr.msk.bf16.gmra.mrb[24].mxu1 %vm1407_vm0, %v5006_v16  ;;  %1459 = vmatpush1.bf16.msra.mxu0 %v4298_v18  ;;  %v4349_v18 = vld [vmem:[%s6266_s1 + $0x2c4] ss:$16 sps:$4 sm:$0xff]  }
  0x49   :  { %1909 = vmatpush1.bf16.msra.mxu1 %v4295_v17  ;;  %1460 = vmatprep.subr.bf16.mxu0 %v4299_v20  ;;  %v90_v17 = vld [vmem:[%s6265_s0 + $0x188] sm:$0xff] }
  0x4a   :  { %1910 = vmatprep.subr.bf16.mxu1 %v4303_v21  ;;  %1873 = vmatprep.mubr.bf16.mxu1 %v4712_v0  ;;  %v4352_v20 = vld [vmem:[%s6266_s1 + $0x2ac] ss:$16 sps:$4 sm:$0xff]  }
  0x4c   :  { %1461 = vmatpush1.bf16.msra.mxu0 %v4304_v23  ;;  %v105_v23 = vld [vmem:[%s6265_s0 + $0x200] sm:$0xff] }
  0x4d   :  { %1911 = vmatpush1.bf16.msra.mxu1 %v4301_v22  ;;  %1462 = vmatprep.subr.bf16.mxu0 %v4305_v24  ;;  %v98_v22 = vld [vmem:[%s6265_s0 + $0x1c8] sm:$0xff]  ;;  %v4347_v24 = vld [vmem:[%s6266_s1 + $0x2c0] ss:$16 sps:$4 sm:$0xff]  }
  0x4e   :  { %1912 = vmatprep.subr.bf16.mxu1 %v4309_v27  ;;  %v4358_v27 = vld [vmem:[%s6266_s1 + $0x2cc] ss:$16 sps:$4 sm:$0xff]   ;;  %v182_v32 = vpack.c.bf16 %v105_v23, %v98_v22  ;;  %v4395_v22 = vld [vmem:[%s6266_s1 + $0x3c0] ss:$16 sps:$4 sm:$0xff]  }
  0x50   :  { %3737 = vmatmul.mubr.msk.bf16.gmra.mrb[28].mxu1 %vm1407_vm0, %v5044_v29  ;;  %1463 = vmatpush1.bf16.msra.mxu0 %v4310_v30  ;;  %v4356_v30 = vld [vmem:[%s6266_s1 + $0x2c8] ss:$16 sps:$4 sm:$0xff]  }
  0x51   :  { %1913 = vmatpush1.bf16.msra.mxu1 %v4307_v28  ;;  %1545 = vmatprep.subr.bf16.mxu0 %v4313_v34  ;;  %v4353_v28 = vld [vmem:[%s6266_s1 + $0x2e0] ss:$16 sps:$4 sm:$0xff]   ;;  %v104_v34 = vld [vmem:[%s6265_s0 + $0x1f8] sm:$0xff] }
  0x52   :  { %1914 = vmatprep.subr.bf16.mxu1 %v4316_v35  ;;  %1916 = vmatprep.mubr.bf16.mxu1 %v154_v15  ;;  %v83_v15 = vld [vmem:[%s6265_s0 + $0x150] sm:$0xff] }
  0x53   :  { %1465 = vmatmul.mubr.bf16.vlgmr.msra.gmra.mrb[0].mxu0 %v153_v38  ;;  %v174_v21 = vpack.c.bf16 %v90_v17, %v83_v15  ;;  %v4361_v35 = vld [vmem:[%s6266_s1 + $0x304] ss:$16 sps:$4 sm:$0xff]   ;;  %v4392_v15 = vld [vmem:[%s6266_s1 + $0x388] ss:$16 sps:$4 sm:$0xff]  }
  0x54   :  { %1546 = vmatpush1.bf16.msra.mxu0 %v4311_v36  ;;  %1474 = vmatprep.mubr.bf16.mxu0 %v161_v44  ;;  %v4364_v36 = vld [vmem:[%s6266_s1 + $0x2ec] ss:$16 sps:$4 sm:$0xff]   ;;  %v139_v17 = vld [vmem:[%s6265_s0 + $0x310] sm:$0xff] }
  0x55   :  { %1915 = vmatpush1.bf16.msra.mxu1 %v4314_v37  ;;  %1547 = vmatprep.subr.bf16.mxu0 %v4319_v41  ;;  %v4359_v37 = vld [vmem:[%s6266_s1 + $0x300] ss:$16 sps:$4 sm:$0xff]  }
  0x56   :  { %1997 = vmatprep.subr.bf16.mxu1 %v4322_v43  ;;  %v119_v41 = vld [vmem:[%s6265_s0 + $0x270] sm:$0xff] }
  0x57   :  { %v4367_v43 = vld [vmem:[%s6266_s1 + $0x324] ss:$16 sps:$4 sm:$0xff]  }
  0x58   :  { %1917 = vmatmul.mubr.bf16.vlgmr.msra.gmra.mrb[32].mxu1 %v153_v38  ;;  %1548 = vmatpush1.bf16.msra.mxu0 %v4317_v45  ;;  %v181_v38 = vpack.c.bf16 %v104_v34, %v97_v33  ;;  %v4365_v45 = vld [vmem:[%s6266_s1 + $0x320] ss:$16 sps:$4 sm:$0xff]  }
  0x59   :  { %1998 = vmatpush1.bf16.msra.mxu1 %v4320_v46  ;;  %1549 = vmatprep.subr.bf16.mxu0 %v4325_v49  ;;  %v189_v46 = vpack.c.bf16 %v119_v41, %v112_v40  ;;  %v118_v49 = vld [vmem:[%s6265_s0 + $0x268] sm:$0xff]  ;;  %v43_v34 = vld [vmem:[%s6265_s0 + $0x10] sm:$0xff]  ;;  %v65_v40 = vld [vmem:[%s6265_s0 + $0xc0] sm:$0xff] }
  0x5a   :  { %1999 = vmatprep.subr.bf16.mxu1 %v4328_v50  ;;  %1926 = vmatprep.mubr.bf16.mxu1 %v161_v44  ;;  %v4370_v44 = vld [vmem:[%s6266_s1 + $0x30c] ss:$16 sps:$4 sm:$0xff]   ;;  %v4373_v50 = vld [vmem:[%s6266_s1 + $0x344] ss:$16 sps:$4 sm:$0xff]   ;;  %v188_v55 = vpack.c.bf16 %v118_v49, %v111_v48  ;;  %v4407_v41 = vld [vmem:[%s6266_s1 + $0x400] ss:$16 sps:$4 sm:$0xff]  }
  0x5b   :  { %1475 = vmatmul.mubr.bf16.gmra.mrb[4].mxu0 %v160_v54  ;;  %v57_v49 = vld [vmem:[%s6265_s0 + $0x80] sm:$0xff] }
  0x5c   :  { %1550 = vmatpush1.bf16.msra.mxu0 %v4323_v51  ;;  %1484 = vmatprep.mubr.bf16.mxu0 %v168_v60  ;;  %v4376_v51 = vld [vmem:[%s6266_s1 + $0x32c] ss:$16 sps:$4 sm:$0xff]  }
  0x5d   :  { %2000 = vmatpush1.bf16.msra.mxu1 %v4326_v52  ;;  %1551 = vmatprep.subr.bf16.mxu0 %v4331_v57  ;;  %v4371_v52 = vld [vmem:[%s6266_s1 + $0x340] ss:$16 sps:$4 sm:$0xff]  }
  0x5e   :  { %2001 = vmatprep.subr.bf16.mxu1 %v4334_v58  ;;  %v133_v57 = vld [vmem:[%s6265_s0 + $0x2e0] sm:$0xff] }
  0x5f   :  { %v4379_v58 = vld [vmem:[%s6266_s1 + $0x364] ss:$16 sps:$4 sm:$0xff]  }
  0x60   :  { %1927 = vmatmul.mubr.bf16.gmra.mrb[36].mxu1 %v160_v54  ;;  %1552 = vmatpush1.bf16.msra.mxu0 %v4329_v59  ;;  %v4374_v54 = vld [vmem:[%s6266_s1 + $0x328] ss:$16 sps:$4 sm:$0xff]   ;;  %v4382_v59 = vld [vmem:[%s6266_s1 + $0x34c] ss:$16 sps:$4 sm:$0xff]  }
  0x61   :  { %2002 = vmatpush1.bf16.msra.mxu1 %v4332_v61  ;;  %1553 = vmatprep.subr.bf16.mxu0 %v4337_v2  ;;  %v4377_v61 = vld [vmem:[%s6266_s1 + $0x360] ss:$16 sps:$4 sm:$0xff]   ;;  %v132_v2 = vld [vmem:[%s6265_s0 + $0x2d8] sm:$0xff] }
  0x62   :  { %2003 = vmatprep.subr.bf16.mxu1 %v4340_v3  ;;  %1936 = vmatprep.mubr.bf16.mxu1 %v168_v60  ;;  %v196_v60 = vpack.c.bf16 %v133_v57, %v126_v56  ;;  %v4385_v3 = vld [vmem:[%s6266_s1 + $0x384] ss:$16 sps:$4 sm:$0xff]   ;;  %v195_v7 = vpack.c.bf16 %v132_v2, %v125_v63  ;;  %v4422_v56 = vld [vmem:[%s6266_s1 + $0x428] ss:$16 sps:$4 sm:$0xff]  }
  0x63   :  { %1485 = vmatmul.mubr.bf16.gmra.mrb[8].mxu0 %v167_v5  ;;  %v72_v57 = vld [vmem:[%s6265_s0 + $0xf8] sm:$0xff]  ;;  %v71_v2 = vld [vmem:[%s6265_s0 + $0xf0] sm:$0xff] }
  0x64   :  { %1554 = vmatpush1.bf16.msra.mxu0 %v4335_v4  ;;  %1494 = vmatprep.mubr.bf16.mxu0 %v175_v14  ;;  %v4388_v4 = vld [vmem:[%s6266_s1 + $0x36c] ss:$16 sps:$4 sm:$0xff]   ;;  %v4428_v63 = vld [vmem:[%s6266_s1 + $0x448] ss:$16 sps:$4 sm:$0xff]  }
  0x65   :  { %2004 = vmatpush1.bf16.msra.mxu1 %v4338_v9  ;;  %1555 = vmatprep.subr.bf16.mxu0 %v4343_v10  ;;  %v140_v9 = vld [vmem:[%s6265_s0 + $0x318] sm:$0xff]  ;;  %v147_v10 = vld [vmem:[%s6265_s0 + $0x350] sm:$0xff] }
  0x66   :  { %2005 = vmatprep.subr.bf16.mxu1 %v4346_v11  ;;  %v4391_v11 = vld [vmem:[%s6266_s1 + $0x3a4] ss:$16 sps:$4 sm:$0xff]  }
  0x68   :  { %1937 = vmatmul.mubr.bf16.gmra.mrb[40].mxu1 %v167_v5  ;;  %1556 = vmatpush1.bf16.msra.mxu0 %v4341_v12  ;;  %v4383_v5 = vld [vmem:[%s6266_s1 + $0x380] ss:$16 sps:$4 sm:$0xff]   ;;  %v4394_v12 = vld [vmem:[%s6266_s1 + $0x38c] ss:$16 sps:$4 sm:$0xff]  }
  0x69   :  { %2006 = vmatpush1.bf16.msra.mxu1 %v4344_v13  ;;  %1557 = vmatprep.subr.bf16.mxu0 %v4349_v18  ;;  %v4389_v13 = vld [vmem:[%s6266_s1 + $0x3a0] ss:$16 sps:$4 sm:$0xff]   ;;  %v146_v18 = vld [vmem:[%s6265_s0 + $0x348] sm:$0xff] }
  0x6a   :  { %2007 = vmatprep.subr.bf16.mxu1 %v4352_v20  ;;  %1946 = vmatprep.mubr.bf16.mxu1 %v175_v14  ;;  %v203_v14 = vpack.c.bf16 %v147_v10, %v140_v9  ;;  %v4397_v20 = vld [vmem:[%s6266_s1 + $0x3c4] ss:$16 sps:$4 sm:$0xff]   ;;  %v202_v23 = vpack.c.bf16 %v146_v18, %v139_v17  ;;  %v86_v10 = vld [vmem:[%s6265_s0 + $0x168] sm:$0xff] }
  0x6b   :  { %1495 = vmatmul.mubr.bf16.gmra.mrb[12].mxu0 %v174_v21  ;;  %v4440_v17 = vld [vmem:[%s6266_s1 + $0x488] ss:$16 sps:$4 sm:$0xff]   ;;  %v85_v18 = vld [vmem:[%s6265_s0 + $0x160] sm:$0xff] }
  0x6c   :  { %1558 = vmatpush1.bf16.msra.mxu0 %v4347_v24  ;;  %1504 = vmatprep.mubr.bf16.mxu0 %v182_v32  ;;  %v44_v24 = vld [vmem:[%s6265_s0 + $0x18] sm:$0xff] }
  0x6d   :  { %2008 = vmatpush1.bf16.msra.mxu1 %v4350_v25  ;;  %1559 = vmatprep.subr.bf16.mxu0 %v4355_v26  ;;  %v51_v25 = vld [vmem:[%s6265_s0 + $0x50] sm:$0xff]  ;;  %v4398_v26 = vld [vmem:[%s6266_s1 + $0x3a8] ss:$16 sps:$4 sm:$0xff]  }
  0x6e   :  { %2009 = vmatprep.subr.bf16.mxu1 %v4358_v27  ;;  %v4403_v27 = vld [vmem:[%s6266_s1 + $0x3e4] ss:$16 sps:$4 sm:$0xff]   ;;  %v156_v33 = vpack.c.bf16 %v51_v25, %v44_v24  ;;  %v4446_v24 = vld [vmem:[%s6266_s1 + $0x4a8] ss:$16 sps:$4 sm:$0xff]  }
  0x70   :  { %1947 = vmatmul.mubr.bf16.gmra.mrb[44].mxu1 %v174_v21  ;;  %1560 = vmatpush1.bf16.msra.mxu0 %v4353_v28  ;;  %v4400_v21 = vld [vmem:[%s6266_s1 + $0x3ac] ss:$16 sps:$4 sm:$0xff]  }
  0x71   :  { %2010 = vmatpush1.bf16.msra.mxu1 %v4356_v30  ;;  %1561 = vmatprep.subr.bf16.mxu0 %v4361_v35  ;;  %v4406_v28 = vld [vmem:[%s6266_s1 + $0x3cc] ss:$16 sps:$4 sm:$0xff]   ;;  %v4401_v30 = vld [vmem:[%s6266_s1 + $0x3e0] ss:$16 sps:$4 sm:$0xff]  }
  0x72   :  { %2011 = vmatprep.subr.bf16.mxu1 %v4364_v36  ;;  %1956 = vmatprep.mubr.bf16.mxu1 %v182_v32  ;;  %v4404_v32 = vld [vmem:[%s6266_s1 + $0x3c8] ss:$16 sps:$4 sm:$0xff]   ;;  %v4409_v36 = vld [vmem:[%s6266_s1 + $0x404] ss:$16 sps:$4 sm:$0xff]  }
  0x73   :  { %1505 = vmatmul.mubr.bf16.gmra.mrb[16].mxu0 %v181_v38  ;;  %v50_v35 = vld [vmem:[%s6265_s0 + $0x48] sm:$0xff] }
  0x74   :  { %1562 = vmatpush1.bf16.msra.mxu0 %v4359_v37  ;;  %1514 = vmatprep.mubr.bf16.mxu0 %v189_v46  ;;  %v4412_v37 = vld [vmem:[%s6266_s1 + $0x3ec] ss:$16 sps:$4 sm:$0xff]  }
  0x75   :  { %2012 = vmatpush1.bf16.msra.mxu1 %v4362_v39  ;;  %1563 = vmatprep.subr.bf16.mxu0 %v4367_v43  ;;  %v58_v39 = vld [vmem:[%s6265_s0 + $0x88] sm:$0xff] }
  0x76   :  { %2013 = vmatprep.subr.bf16.mxu1 %v4370_v44  ;;  %v4410_v43 = vld [vmem:[%s6266_s1 + $0x3e8] ss:$16 sps:$4 sm:$0xff]   ;;  %v4415_v44 = vld [vmem:[%s6266_s1 + $0x424] ss:$16 sps:$4 sm:$0xff]   ;;  %v163_v48 = vpack.c.bf16 %v65_v40, %v58_v39 }
  0x77   :  { %v114_v40 = vld [vmem:[%s6265_s0 + $0x248] sm:$0xff] }
  0x78   :  { %1957 = vmatmul.mubr.bf16.gmra.mrb[48].mxu1 %v181_v38  ;;  %1564 = vmatpush1.bf16.msra.mxu0 %v4365_v45  ;;  %v155_v38 = vpack.c.bf16 %v50_v35, %v43_v34  ;;  %v4418_v45 = vld [vmem:[%s6266_s1 + $0x40c] ss:$16 sps:$4 sm:$0xff]   ;;  %v4452_v34 = vld [vmem:[%s6266_s1 + $0x4c8] ss:$16 sps:$4 sm:$0xff]   ;;  %v99_v35 = vld [vmem:[%s6265_s0 + $0x1d0] sm:$0xff] }
  0x79   :  { %2014 = vmatpush1.bf16.msra.mxu1 %v4368_v47  ;;  %1565 = vmatprep.subr.bf16.mxu0 %v4373_v50  ;;  %v4416_v47 = vld [vmem:[%s6266_s1 + $0x408] ss:$16 sps:$4 sm:$0xff]  }
  0x7a   :  { %2015 = vmatprep.subr.bf16.mxu1 %v4376_v51  ;;  %1966 = vmatprep.mubr.bf16.mxu1 %v189_v46  ;;  %v4413_v46 = vld [vmem:[%s6266_s1 + $0x420] ss:$16 sps:$4 sm:$0xff]   ;;  %v64_v50 = vld [vmem:[%s6265_s0 + $0xb8] sm:$0xff]  ;;  %v4421_v51 = vld [vmem:[%s6266_s1 + $0x444] ss:$16 sps:$4 sm:$0xff]  }
  0x7b   :  { %1515 = vmatmul.mubr.bf16.gmra.mrb[20].mxu0 %v188_v55 }
  0x7c   :  { %1566 = vmatpush1.bf16.msra.mxu0 %v4371_v52  ;;  %1524 = vmatprep.mubr.bf16.mxu0 %v196_v60  ;;  %v4424_v52 = vld [vmem:[%s6266_s1 + $0x42c] ss:$16 sps:$4 sm:$0xff]  }
  0x7d   :  { %2016 = vmatpush1.bf16.msra.mxu1 %v4374_v54  ;;  %1567 = vmatprep.subr.bf16.mxu0 %v4379_v58  ;;  %v4419_v54 = vld [vmem:[%s6266_s1 + $0x440] ss:$16 sps:$4 sm:$0xff]  }
  0x7e   :  { %2017 = vmatprep.subr.bf16.mxu1 %v4382_v59  ;;  %v79_v58 = vld [vmem:[%s6265_s0 + $0x130] sm:$0xff] }
  0x7f   :  { %v4427_v59 = vld [vmem:[%s6266_s1 + $0x464] ss:$16 sps:$4 sm:$0xff]  }
  0x80   :  { %1967 = vmatmul.mubr.bf16.gmra.mrb[52].mxu1 %v188_v55  ;;  %1568 = vmatpush1.bf16.msra.mxu0 %v4377_v61  ;;  %v162_v55 = vpack.c.bf16 %v64_v50, %v57_v49  ;;  %v4425_v61 = vld [vmem:[%s6266_s1 + $0x460] ss:$16 sps:$4 sm:$0xff]   ;;  %v4464_v49 = vld [vmem:[%s6266_s1 + $0x508] ss:$16 sps:$4 sm:$0xff]  }
  0x81   :  { %2018 = vmatpush1.bf16.msra.mxu1 %v4380_v62  ;;  %1569 = vmatprep.subr.bf16.mxu0 %v4385_v3  ;;  %v170_v62 = vpack.c.bf16 %v79_v58, %v72_v57  ;;  %v78_v3 = vld [vmem:[%s6265_s0 + $0x128] sm:$0xff]  ;;  %v113_v50 = vld [vmem:[%s6265_s0 + $0x240] sm:$0xff] }
  0x82   :  { %2019 = vmatprep.subr.bf16.mxu1 %v4388_v4  ;;  %1976 = vmatprep.mubr.bf16.mxu1 %v196_v60  ;;  %v4430_v60 = vld [vmem:[%s6266_s1 + $0x44c] ss:$16 sps:$4 sm:$0xff]   ;;  %v4433_v4 = vld [vmem:[%s6266_s1 + $0x484] ss:$16 sps:$4 sm:$0xff]   ;;  %v169_v9 = vpack.c.bf16 %v78_v3, %v71_v2 }
  0x83   :  { %1525 = vmatmul.mubr.bf16.gmra.mrb[24].mxu0 %v195_v7  ;;  %v4475_v58 = vld [vmem:[%s6266_s1 + $0x564] ss:$16 sps:$4 sm:$0xff]  }
  0x84   :  { %1570 = vmatpush1.bf16.msra.mxu0 %v4383_v5  ;;  %1534 = vmatprep.mubr.bf16.mxu0 %v203_v14  ;;  %v4436_v5 = vld [vmem:[%s6266_s1 + $0x46c] ss:$16 sps:$4 sm:$0xff]   ;;  %v127_v3 = vld [vmem:[%s6265_s0 + $0x2b0] sm:$0xff] }
  0x85   :  { %2020 = vmatpush1.bf16.msra.mxu1 %v4386_v6  ;;  %1571 = vmatprep.subr.bf16.mxu0 %v4391_v11  ;;  %v4431_v6 = vld [vmem:[%s6266_s1 + $0x480] ss:$16 sps:$4 sm:$0xff]  }
  0x86   :  { %2021 = vmatprep.subr.bf16.mxu1 %v4394_v12  ;;  %v93_v11 = vld [vmem:[%s6265_s0 + $0x1a0] sm:$0xff] }
  0x87   :  { %v4439_v12 = vld [vmem:[%s6266_s1 + $0x4a4] ss:$16 sps:$4 sm:$0xff]  }
  0x88   :  { %1977 = vmatmul.mubr.bf16.gmra.mrb[56].mxu1 %v195_v7  ;;  %1572 = vmatpush1.bf16.msra.mxu0 %v4389_v13  ;;  %v4434_v7 = vld [vmem:[%s6266_s1 + $0x468] ss:$16 sps:$4 sm:$0xff]   ;;  %v4442_v13 = vld [vmem:[%s6266_s1 + $0x48c] ss:$16 sps:$4 sm:$0xff]  }
  0x89   :  { %2022 = vmatpush1.bf16.msra.mxu1 %v4392_v15  ;;  %1573 = vmatprep.subr.bf16.mxu0 %v4397_v20  ;;  %v4437_v15 = vld [vmem:[%s6266_s1 + $0x4a0] ss:$16 sps:$4 sm:$0xff]   ;;  %v92_v20 = vld [vmem:[%s6265_s0 + $0x198] sm:$0xff] }
  0x8a   :  { %2023 = vmatprep.subr.bf16.mxu1 %v4400_v21  ;;  %1986 = vmatprep.mubr.bf16.mxu1 %v203_v14  ;;  %v177_v14 = vpack.c.bf16 %v93_v11, %v86_v10  ;;  %v4445_v21 = vld [vmem:[%s6266_s1 + $0x4c4] ss:$16 sps:$4 sm:$0xff]   ;;  %v176_v25 = vpack.c.bf16 %v92_v20, %v85_v18  ;;  %v4479_v10 = vld [vmem:[%s6266_s1 + $0x580] ss:$16 sps:$4 sm:$0xff]   ;;  %v4482_v11 = vld [vmem:[%s6266_s1 + $0x568] ss:$16 sps:$4 sm:$0xff]  }
  0x8b   :  { %1535 = vmatmul.mubr.bf16.gmra.mrb[28].mxu0 %v202_v23  ;;  %v141_v20 = vld [vmem:[%s6265_s0 + $0x320] sm:$0xff] }
  0x8c   :  { %1574 = vmatpush1.bf16.msra.mxu0 %v4395_v22  ;;  %1577 = vmatprep.mubr.bf16.mxu0 %v156_v33  ;;  %v4448_v22 = vld [vmem:[%s6266_s1 + $0x4ac] ss:$16 sps:$4 sm:$0xff]  }
  0x8d   :  { %2024 = vmatpush1.bf16.msra.mxu1 %v4398_v26  ;;  %1575 = vmatprep.subr.bf16.mxu0 %v4403_v27  ;;  %v100_v26 = vld [vmem:[%s6265_s0 + $0x1d8] sm:$0xff]  ;;  %v107_v27 = vld [vmem:[%s6265_s0 + $0x210] sm:$0xff] }
  0x8e   :  { %2025 = vmatprep.subr.bf16.mxu1 %v4406_v28  ;;  %v4451_v28 = vld [vmem:[%s6266_s1 + $0x4e4] ss:$16 sps:$4 sm:$0xff]  }
  0x90   :  { %1987 = vmatmul.mubr.bf16.gmra.mrb[60].mxu1 %v202_v23  ;;  %1576 = vmatpush1.bf16.msra.mxu0 %v4401_v30  ;;  %v4443_v23 = vld [vmem:[%s6266_s1 + $0x4c0] ss:$16 sps:$4 sm:$0xff]   ;;  %v4454_v30 = vld [vmem:[%s6266_s1 + $0x4cc] ss:$16 sps:$4 sm:$0xff]  }
  0x91   :  { %2026 = vmatpush1.bf16.msra.mxu1 %v4404_v32  ;;  %1658 = vmatprep.subr.bf16.mxu0 %v4409_v36  ;;  %v4449_v32 = vld [vmem:[%s6266_s1 + $0x4e0] ss:$16 sps:$4 sm:$0xff]   ;;  %v106_v36 = vld [vmem:[%s6265_s0 + $0x208] sm:$0xff] }
  0x92   :  { %2027 = vmatprep.subr.bf16.mxu1 %v4412_v37  ;;  %2029 = vmatprep.mubr.bf16.mxu1 %v156_v33  ;;  %v184_v33 = vpack.c.bf16 %v107_v27, %v100_v26  ;;  %v4457_v37 = vld [vmem:[%s6266_s1 + $0x504] ss:$16 sps:$4 sm:$0xff]   ;;  %v183_v39 = vpack.c.bf16 %v106_v36, %v99_v35  ;;  %v4491_v26 = vld [vmem:[%s6266_s1 + $0x5c0] ss:$16 sps:$4 sm:$0xff]   ;;  %v4494_v27 = vld [vmem:[%s6266_s1 + $0x5a8] ss:$16 sps:$4 sm:$0xff]  }
  0x93   :  { %1578 = vmatmul.mubr.bf16.vlgmr.msra.gmra.mrb[0].mxu0 %v155_v38  ;;  %v45_v36 = vld [vmem:[%s6265_s0 + $0x20] sm:$0xff] }
  0x94   :  { %1659 = vmatpush1.bf16.msra.mxu0 %v4407_v41  ;;  %1587 = vmatprep.mubr.bf16.mxu0 %v163_v48  ;;  %v121_v41 = vld [vmem:[%s6265_s0 + $0x280] sm:$0xff] }
  0x95   :  { %2028 = vmatpush1.bf16.msra.mxu1 %v4410_v43  ;;  %1660 = vmatprep.subr.bf16.mxu0 %v4415_v44  ;;  %v4455_v43 = vld [vmem:[%s6266_s1 + $0x500] ss:$16 sps:$4 sm:$0xff]   ;;  %v4458_v44 = vld [vmem:[%s6266_s1 + $0x4e8] ss:$16 sps:$4 sm:$0xff]  }
  0x96   :  { %2110 = vmatprep.subr.bf16.mxu1 %v4418_v45  ;;  %v4463_v45 = vld [vmem:[%s6266_s1 + $0x524] ss:$16 sps:$4 sm:$0xff]  }
  0x98   :  { %2030 = vmatmul.mubr.bf16.vlgmr.msra.gmra.mrb[32].mxu1 %v155_v38  ;;  %1661 = vmatpush1.bf16.msra.mxu0 %v4413_v46  ;;  %v4460_v38 = vld [vmem:[%s6266_s1 + $0x4ec] ss:$16 sps:$4 sm:$0xff]  }
  0x99   :  { %2111 = vmatpush1.bf16.msra.mxu1 %v4416_v47  ;;  %1662 = vmatprep.subr.bf16.mxu0 %v4421_v51  ;;  %v4466_v46 = vld [vmem:[%s6266_s1 + $0x50c] ss:$16 sps:$4 sm:$0xff]   ;;  %v191_v47 = vpack.c.bf16 %v121_v41, %v114_v40  ;;  %v67_v40 = vld [vmem:[%s6265_s0 + $0xd0] sm:$0xff] }
  0x9a   :  { %2112 = vmatprep.subr.bf16.mxu1 %v4424_v52  ;;  %2039 = vmatprep.mubr.bf16.mxu1 %v163_v48  ;;  %v4461_v48 = vld [vmem:[%s6266_s1 + $0x520] ss:$16 sps:$4 sm:$0xff]   ;;  %v120_v51 = vld [vmem:[%s6265_s0 + $0x278] sm:$0xff]  ;;  %v4469_v52 = vld [vmem:[%s6266_s1 + $0x544] ss:$16 sps:$4 sm:$0xff]  }
  0x9b   :  { %1588 = vmatmul.mubr.bf16.gmra.mrb[4].mxu0 %v162_v55  ;;  %v190_v57 = vpack.c.bf16 %v120_v51, %v113_v50  ;;  %v59_v50 = vld [vmem:[%s6265_s0 + $0x90] sm:$0xff]  ;;  %v66_v51 = vld [vmem:[%s6265_s0 + $0xc8] sm:$0xff] }
  0x9c   :  { %1663 = vmatpush1.bf16.msra.mxu0 %v4419_v54  ;;  %1597 = vmatprep.mubr.bf16.mxu0 %v170_v62  ;;  %v4472_v54 = vld [vmem:[%s6266_s1 + $0x52c] ss:$16 sps:$4 sm:$0xff]  }
  0x9d   :  { %2113 = vmatpush1.bf16.msra.mxu1 %v4422_v56  ;;  %1664 = vmatprep.subr.bf16.mxu0 %v4427_v59  ;;  %v4470_v56 = vld [vmem:[%s6266_s1 + $0x528] ss:$16 sps:$4 sm:$0xff]   ;;  %v4478_v59 = vld [vmem:[%s6266_s1 + $0x54c] ss:$16 sps:$4 sm:$0xff]  }
  0x9e   :  { %2114 = vmatprep.subr.bf16.mxu1 %v4430_v60  ;;  %v128_v60 = vld [vmem:[%s6265_s0 + $0x2b8] sm:$0xff] }
  0xa0   :  { %2040 = vmatmul.mubr.bf16.gmra.mrb[36].mxu1 %v162_v55  ;;  %1665 = vmatpush1.bf16.msra.mxu0 %v4425_v61  ;;  %v4467_v55 = vld [vmem:[%s6266_s1 + $0x540] ss:$16 sps:$4 sm:$0xff]  }
  0xa1   :  { %2115 = vmatpush1.bf16.msra.mxu1 %v4428_v63  ;;  %1666 = vmatprep.subr.bf16.mxu0 %v4433_v4  ;;  %v135_v61 = vld [vmem:[%s6265_s0 + $0x2f0] sm:$0xff]  ;;  %v4476_v63 = vld [vmem:[%s6266_s1 + $0x548] ss:$16 sps:$4 sm:$0xff]  }
  0xa2   :  { %2116 = vmatprep.subr.bf16.mxu1 %v4436_v5  ;;  %2049 = vmatprep.mubr.bf16.mxu1 %v170_v62  ;;  %v4473_v62 = vld [vmem:[%s6266_s1 + $0x560] ss:$16 sps:$4 sm:$0xff]   ;;  %v198_v2 = vpack.c.bf16 %v135_v61, %v128_v60  ;;  %v134_v4 = vld [vmem:[%s6265_s0 + $0x2e8] sm:$0xff]  ;;  %v4481_v5 = vld [vmem:[%s6266_s1 + $0x584] ss:$16 sps:$4 sm:$0xff]  }
  0xa3   :  { %1598 = vmatmul.mubr.bf16.gmra.mrb[8].mxu0 %v169_v9  ;;  %v73_v60 = vld [vmem:[%s6265_s0 + $0x100] sm:$0xff]  ;;  %v80_v61 = vld [vmem:[%s6265_s0 + $0x138] sm:$0xff] }
  0xa4   :  { %1667 = vmatpush1.bf16.msra.mxu0 %v4431_v6  ;;  %1607 = vmatprep.mubr.bf16.mxu0 %v177_v14  ;;  %v4484_v6 = vld [vmem:[%s6266_s1 + $0x56c] ss:$16 sps:$4 sm:$0xff]  }
  0xa5   :  { %2117 = vmatpush1.bf16.msra.mxu1 %v4434_v7  ;;  %1668 = vmatprep.subr.bf16.mxu0 %v4439_v12  ;;  %v142_v7 = vld [vmem:[%s6265_s0 + $0x328] sm:$0xff]  ;;  %v197_v12 = vpack.c.bf16 %v134_v4, %v127_v3  ;;  %v4518_v3 = vld [vmem:[#allocation2 + $0x30] ss:$8 sps:$4 sm:$0xff]  }
  0xa6   :  { %2118 = vmatprep.subr.bf16.mxu1 %v4442_v13  ;;  %v4487_v13 = vld [vmem:[%s6266_s1 + $0x5a4] ss:$16 sps:$4 sm:$0xff]  }
  0xa7   :  { %v4523_v4 = vld [vmem:[#allocation2 + $0x44] ss:$8 sps:$4 sm:$0xff]  }
  0xa8   :  { %2050 = vmatmul.mubr.bf16.gmra.mrb[40].mxu1 %v169_v9  ;;  %1669 = vmatpush1.bf16.msra.mxu0 %v4437_v15  ;;  %v149_v9 = vld [vmem:[%s6265_s0 + $0x360] sm:$0xff] }
  0xa9   :  { %2119 = vmatpush1.bf16.msra.mxu1 %v4440_v17  ;;  %1670 = vmatprep.subr.bf16.mxu0 %v4445_v21  ;;  %v4485_v15 = vld [vmem:[%s6266_s1 + $0x5a0] ss:$16 sps:$4 sm:$0xff]   ;;  %v4488_v17 = vld [vmem:[%s6266_s1 + $0x588] ss:$16 sps:$4 sm:$0xff]   ;;  %v205_v18 = vpack.c.bf16 %v149_v9, %v142_v7  ;;  %v4526_v9 = vld [vmem:[#allocation2 + $0x54] ss:$8 sps:$4 sm:$0xff]  }
  0xaa   :  { %2120 = vmatprep.subr.bf16.mxu1 %v4448_v22  ;;  %2059 = vmatprep.mubr.bf16.mxu1 %v177_v14  ;;  %v4490_v14 = vld [vmem:[%s6266_s1 + $0x58c] ss:$16 sps:$4 sm:$0xff]   ;;  %v4493_v22 = vld [vmem:[%s6266_s1 + $0x5c4] ss:$16 sps:$4 sm:$0xff]   ;;  %v4521_v7 = vld [vmem:[#allocation2 + $0x40] ss:$8 sps:$4 sm:$0xff]  }
  0xab   :  { %1608 = vmatmul.mubr.bf16.gmra.mrb[12].mxu0 %v176_v25  ;;  %v148_v21 = vld [vmem:[%s6265_s0 + $0x358] sm:$0xff] }
  0xac   :  { %1671 = vmatpush1.bf16.msra.mxu0 %v4443_v23  ;;  %1617 = vmatprep.mubr.bf16.mxu0 %v184_v33  ;;  %v4496_v23 = vld [vmem:[%s6266_s1 + $0x5ac] ss:$16 sps:$4 sm:$0xff]  }
  0xad   :  { %2121 = vmatpush1.bf16.msra.mxu1 %v4446_v24  ;;  %1672 = vmatprep.subr.bf16.mxu0 %v4451_v28  ;;  %v46_v24 = vld [vmem:[%s6265_s0 + $0x28] sm:$0xff]  ;;  %v204_v28 = vpack.c.bf16 %v148_v21, %v141_v20 }
  0xae   :  { %2122 = vmatprep.subr.bf16.mxu1 %v4454_v30  ;;  %v4499_v30 = vld [vmem:[%s6266_s1 + $0x5e4] ss:$16 sps:$4 sm:$0xff]   ;;  %v4527_v20 = vld [vmem:[#allocation2 + $0x60] ss:$8 sps:$4 sm:$0xff]  }
  0xb0   :  { %2060 = vmatmul.mubr.bf16.gmra.mrb[44].mxu1 %v176_v25  ;;  %1673 = vmatpush1.bf16.msra.mxu0 %v4449_v32  ;;  %v53_v25 = vld [vmem:[%s6265_s0 + $0x60] sm:$0xff]  ;;  %v4502_v32 = vld [vmem:[%s6266_s1 + $0x5cc] ss:$16 sps:$4 sm:$0xff]  }
  0xb1   :  { %2123 = vmatpush1.bf16.msra.mxu1 %v4452_v34  ;;  %1674 = vmatprep.subr.bf16.mxu0 %v4457_v37  ;;  %v4500_v34 = vld [vmem:[%s6266_s1 + $0x5c8] ss:$16 sps:$4 sm:$0xff]   ;;  %v158_v35 = vpack.c.bf16 %v53_v25, %v46_v24  ;;  %v101_v25 = vld [vmem:[%s6265_s0 + $0x1e0] sm:$0xff] }
  0xb2   :  { %2124 = vmatprep.subr.bf16.mxu1 %v4460_v38  ;;  %2069 = vmatprep.mubr.bf16.mxu1 %v184_v33  ;;  %v4497_v33 = vld [vmem:[%s6266_s1 + $0x5e0] ss:$16 sps:$4 sm:$0xff]   ;;  %v52_v37 = vld [vmem:[%s6265_s0 + $0x58] sm:$0xff] }
  0xb3   :  { %1618 = vmatmul.mubr.bf16.gmra.mrb[16].mxu0 %v183_v39  ;;  %v4505_v38 = vld [vmem:[%s6266_s1 + $0x5ec] ss:$16 sps:$4 sm:$0xff]   ;;  %v157_v41 = vpack.c.bf16 %v52_v37, %v45_v36  ;;  %v4533_v36 = vld [vmem:[#allocation2 + $0x80] ss:$8 sps:$4 sm:$0xff]  }
  0xb4   :  { %1675 = vmatpush1.bf16.msra.mxu0 %v4455_v43  ;;  %1627 = vmatprep.mubr.bf16.mxu0 %v191_v47  ;;  %v4511_v43 = vld [vmem:[#allocation2 + $0x4] ss:$8 sps:$4 sm:$0xff]  }
  0xb5   :  { %2125 = vmatpush1.bf16.msra.mxu1 %v4458_v44  ;;  %1676 = vmatprep.subr.bf16.mxu0 %v4463_v45  ;;  %v4503_v44 = vld [vmem:[%s6266_s1 + $0x5e8] ss:$16 sps:$4 sm:$0xff]  }
  0xb6   :  { %2126 = vmatprep.subr.bf16.mxu1 %v4466_v46  ;;  %v4508_v46 = vld [vmem:[%s6266_s1 + $0x60c] ss:$16 sps:$4 sm:$0xff]  }
  0xb8   :  { %2070 = vmatmul.mubr.bf16.gmra.mrb[48].mxu1 %v183_v39  ;;  %1677 = vmatpush1.bf16.msra.mxu0 %v4461_v48  ;;  %v60_v39 = vld [vmem:[%s6265_s0 + $0x98] sm:$0xff] }
  0xb9   :  { %2127 = vmatpush1.bf16.msra.mxu1 %v4464_v49  ;;  %1678 = vmatprep.subr.bf16.mxu0 %v4469_v52  ;;  %v165_v45 = vpack.c.bf16 %v67_v40, %v60_v39  ;;  %v4514_v48 = vld [vmem:[#allocation2 + $0x14] ss:$8 sps:$4 sm:$0xff]   ;;  %v4506_v49 = vld [vmem:[%s6266_s1 + $0x608] ss:$16 sps:$4 sm:$0xff]  }
  0xba   :  { %2128 = vmatprep.subr.bf16.mxu1 %v4472_v54  ;;  %2079 = vmatprep.mubr.bf16.mxu1 %v191_v47  ;;  %v4509_v47 = vld [vmem:[#allocation2] ss:$8 sps:$4 sm:$0xff]  }
  0xbb   :  { %1628 = vmatmul.mubr.bf16.gmra.mrb[20].mxu0 %v190_v57  ;;  %v74_v52 = vld [vmem:[%s6265_s0 + $0x108] sm:$0xff]  ;;  %v81_v54 = vld [vmem:[%s6265_s0 + $0x140] sm:$0xff] }
  0xbc   :  { %1679 = vmatpush1.bf16.msra.mxu0 %v4467_v55  ;;  %1637 = vmatprep.mubr.bf16.mxu0 %v198_v2  ;;  %v4512_v55 = vld [vmem:[#allocation2 + $0x10] ss:$8 sps:$4 sm:$0xff]  }
  0xbd   :  { %2129 = vmatpush1.bf16.msra.mxu1 %v4470_v56  ;;  %1680 = vmatprep.subr.bf16.mxu0 %v4475_v58  ;;  %v4517_v56 = vld [vmem:[#allocation2 + $0x24] ss:$8 sps:$4 sm:$0xff]   ;;  %v172_v58 = vpack.c.bf16 %v81_v54, %v74_v52  ;;  %v4544_v54 = vld [vmem:[#allocation2 + $0xb4] ss:$8 sps:$4 sm:$0xff]  }
  0xbe   :  { %2130 = vmatprep.subr.bf16.mxu1 %v4478_v59  ;;  %v4515_v59 = vld [vmem:[#allocation2 + $0x20] ss:$8 sps:$4 sm:$0xff]  }
  0xc0   :  { %2080 = vmatmul.mubr.bf16.gmra.mrb[52].mxu1 %v190_v57  ;;  %1681 = vmatpush1.bf16.msra.mxu0 %v4473_v62  ;;  %v164_v57 = vpack.c.bf16 %v66_v51, %v59_v50  ;;  %v4520_v62 = vld [vmem:[#allocation2 + $0x34] ss:$8 sps:$4 sm:$0xff]   ;;  %v4539_v51 = vld [vmem:[#allocation2 + $0xa0] ss:$8 sps:$4 sm:$0xff]  }
  0xc1   :  { %2131 = vmatpush1.bf16.msra.mxu1 %v4476_v63  ;;  %1682 = vmatprep.subr.bf16.mxu0 %v4481_v5  ;;  %v88_v63 = vld [vmem:[%s6265_s0 + $0x178] sm:$0xff]  ;;  %v171_v5 = vpack.c.bf16 %v80_v61, %v73_v60  ;;  %v151_v61 = vld [vmem:[%s6265_s0 + $0x370] sm:$0xff] }
  0xc2   :  { %2132 = vmatprep.subr.bf16.mxu1 %v4484_v6  ;;  %2089 = vmatprep.mubr.bf16.mxu1 %v198_v2  ;;  %v95_v2 = vld [vmem:[%s6265_s0 + $0x1b0] sm:$0xff]  ;;  %v144_v60 = vld [vmem:[%s6265_s0 + $0x338] sm:$0xff] }
  0xc3   :  { %1638 = vmatmul.mubr.bf16.gmra.mrb[24].mxu0 %v197_v12  ;;  %v179_v6 = vpack.c.bf16 %v95_v2, %v88_v63  ;;  %v4547_v63 = vld [vmem:[#allocation2 + $0xc4] ss:$8 sps:$4 sm:$0xff]  }
  0xc4   :  { %1683 = vmatpush1.bf16.msra.mxu0 %v4479_v10  ;;  %1647 = vmatprep.mubr.bf16.mxu0 %v205_v18  ;;  %v87_v10 = vld [vmem:[%s6265_s0 + $0x170] sm:$0xff] }
  0xc5   :  { %2133 = vmatpush1.bf16.msra.mxu1 %v4482_v11  ;;  %1684 = vmatprep.subr.bf16.mxu0 %v4487_v13  ;;  %v94_v11 = vld [vmem:[%s6265_s0 + $0x1a8] sm:$0xff]  ;;  %v109_v13 = vld [vmem:[%s6265_s0 + $0x220] sm:$0xff] }
  0xc6   :  { %2134 = vmatprep.subr.bf16.mxu1 %v4490_v14  ;;  %v4524_v14 = vld [vmem:[#allocation2 + $0x50] ss:$8 sps:$4 sm:$0xff]  }
  0xc8   :  { %2090 = vmatmul.mubr.bf16.gmra.mrb[56].mxu1 %v197_v12  ;;  %1685 = vmatpush1.bf16.msra.mxu0 %v4485_v15  ;;  %v102_v12 = vld [vmem:[%s6265_s0 + $0x1e8] sm:$0xff] }
  0xc9   :  { %2135 = vmatpush1.bf16.msra.mxu1 %v4488_v17  ;;  %1686 = vmatprep.subr.bf16.mxu0 %v4493_v22  ;;  %v4529_v15 = vld [vmem:[#allocation2 + $0x64] ss:$8 sps:$4 sm:$0xff]   ;;  %v178_v17 = vpack.c.bf16 %v94_v11, %v87_v10  ;;  %v4532_v22 = vld [vmem:[#allocation2 + $0x74] ss:$8 sps:$4 sm:$0xff]  }
  0xca   :  { %2136 = vmatprep.subr.bf16.mxu1 %v4496_v23  ;;  %2099 = vmatprep.mubr.bf16.mxu1 %v205_v18  ;;  %v186_v18 = vpack.c.bf16 %v109_v13, %v102_v12  ;;  %v150_v10 = vld [vmem:[%s6265_s0 + $0x368] sm:$0xff] }
  0xcb   :  { %1648 = vmatmul.mubr.bf16.gmra.mrb[28].mxu0 %v204_v28 }
  0xcc   :  { %1687 = vmatpush1.bf16.msra.mxu0 %v4491_v26  ;;  %1690 = vmatprep.mubr.bf16.mxu0 %v158_v35  ;;  %v108_v26 = vld [vmem:[%s6265_s0 + $0x218] sm:$0xff] }
  0xcd   :  { %2137 = vmatpush1.bf16.msra.mxu1 %v4494_v27  ;;  %1688 = vmatprep.subr.bf16.mxu0 %v4499_v30  ;;  %v123_v30 = vld [vmem:[%s6265_s0 + $0x290] sm:$0xff] }
  0xce   :  { %2138 = vmatprep.subr.bf16.mxu1 %v4502_v32  ;;  %v4530_v32 = vld [vmem:[#allocation2 + $0x70] ss:$8 sps:$4 sm:$0xff]  }
  0xd0   :  { %2100 = vmatmul.mubr.bf16.gmra.mrb[60].mxu1 %v204_v28  ;;  %1689 = vmatpush1.bf16.msra.mxu0 %v4497_v33  ;;  %v116_v28 = vld [vmem:[%s6265_s0 + $0x258] sm:$0xff]  ;;  %v4535_v33 = vld [vmem:[#allocation2 + $0x84] ss:$8 sps:$4 sm:$0xff]  }
  0xd1   :  { %2139 = vmatpush1.bf16.msra.mxu1 %v4500_v34  ;;  %2142 = vmatprep.mubr.bf16.mxu1 %v158_v35  ;;  %v185_v34 = vpack.c.bf16 %v108_v26, %v101_v25  ;;  %v193_v35 = vpack.c.bf16 %v123_v30, %v116_v28 }
  0xd2   :  { %2140 = vmatprep.subr.bf16.mxu1 %v4505_v38  ;;  %2828 = vmatprep.subr.bf16.mxu0 %v4511_v43  ;;  %v4538_v38 = vld [vmem:[#allocation2 + $0x94] ss:$8 sps:$4 sm:$0xff]   ;;  %v122_v43 = vld [vmem:[%s6265_s0 + $0x288] sm:$0xff] }
  0xd3   :  { %1691 = vmatmul.mubr.bf16.vlgmr.msra.gmra.mrb[0].mxu0 %v157_v41 }
  0xd4   :  { %1700 = vmatprep.mubr.bf16.mxu0 %v165_v45  ;;  %2829 = vmatpush1.bf16.msra.mxu0 %v4509_v47  ;;  %v4536_v47 = vld [vmem:[#allocation2 + $0x90] ss:$8 sps:$4 sm:$0xff]  }
  0xd5   :  { %2141 = vmatpush1.bf16.msra.mxu1 %v4503_v44  ;;  %2830 = vmatprep.subr.bf16.mxu0 %v4514_v48  ;;  %v4541_v48 = vld [vmem:[#allocation2 + $0xa4] ss:$8 sps:$4 sm:$0xff]  }
  0xd6   :  { %2223 = vmatprep.subr.bf16.mxu1 %v4508_v46  ;;  %v137_v46 = vld [vmem:[%s6265_s0 + $0x300] sm:$0xff] }
  0xd8   :  { %2143 = vmatmul.mubr.bf16.vlgmr.msra.gmra.mrb[32].mxu1 %v157_v41  ;;  %2831 = vmatpush1.bf16.msra.mxu0 %v4512_v55  ;;  %v115_v41 = vld [vmem:[%s6265_s0 + $0x250] sm:$0xff] }
  0xd9   :  { %2224 = vmatpush1.bf16.msra.mxu1 %v4506_v49  ;;  %2152 = vmatprep.mubr.bf16.mxu1 %v165_v45  ;;  %v130_v45 = vld [vmem:[%s6265_s0 + $0x2c8] sm:$0xff]  ;;  %v192_v49 = vpack.c.bf16 %v122_v43, %v115_v41  ;;  %v4556_v43 = vld [vmem:[#allocation2 + $0xf4] ss:$8 sps:$4 sm:$0xff]  }
  0xda   :  { %2832 = vmatprep.subr.bf16.mxu0 %v4517_v56  ;;  %v200_v50 = vpack.c.bf16 %v137_v46, %v130_v45  ;;  %v4551_v41 = vld [vmem:[#allocation2 + $0xe0] ss:$8 sps:$4 sm:$0xff]   ;;  %v4554_v45 = vld [vmem:[#allocation2 + $0xf0] ss:$8 sps:$4 sm:$0xff]   ;;  %v4559_v46 = vld [vmem:[#allocation2 + $0x104] ss:$8 sps:$4 sm:$0xff]  }
  0xdb   :  { %1701 = vmatmul.mubr.bf16.gmra.mrb[4].mxu0 %v164_v57 }
  0xdc   :  { %1710 = vmatprep.mubr.bf16.mxu0 %v172_v58  ;;  %2833 = vmatpush1.bf16.msra.mxu0 %v4515_v59 }
  0xdd   :  { %2834 = vmatprep.subr.bf16.mxu0 %v4520_v62  ;;  %v4542_v62 = vld [vmem:[#allocation2 + $0xb0] ss:$8 sps:$4 sm:$0xff]  }
  0xe0   :  { %2153 = vmatmul.mubr.bf16.gmra.mrb[36].mxu1 %v164_v57  ;;  %2835 = vmatpush1.bf16.msra.mxu0 %v4518_v3  ;;  %v129_v57 = vld [vmem:[%s6265_s0 + $0x2c0] sm:$0xff]  ;;  %v207_v3 = vpack.c.bf16 %v151_v61, %v144_v60 }
  0xe1   :  { %2162 = vmatprep.mubr.bf16.mxu1 %v172_v58  ;;  %2836 = vmatprep.subr.bf16.mxu0 %v4523_v4  ;;  %v136_v58 = vld [vmem:[%s6265_s0 + $0x2f8] sm:$0xff]  ;;  %v4545_v4 = vld [vmem:[#allocation2 + $0xc0] ss:$8 sps:$4 sm:$0xff]  }
  0xe2   :  { %v199_v2 = vpack.c.bf16 %v136_v58, %v129_v57 }
  0xe3   :  { %1711 = vmatmul.mubr.bf16.gmra.mrb[8].mxu0 %v171_v5 }
  0xe4   :  { %1720 = vmatprep.mubr.bf16.mxu0 %v179_v6  ;;  %2837 = vmatpush1.bf16.msra.mxu0 %v4521_v7 }
  0xe5   :  { %2838 = vmatprep.subr.bf16.mxu0 %v4526_v9  ;;  %v143_v9 = vld [vmem:[%s6265_s0 + $0x330] sm:$0xff] }
  0xe6   :  { %v206_v12 = vpack.c.bf16 %v150_v10, %v143_v9 }
  0xe8   :  { %2163 = vmatmul.mubr.bf16.gmra.mrb[40].mxu1 %v171_v5  ;;  %2839 = vmatpush1.bf16.msra.mxu0 %v4524_v14 }
  0xe9   :  { %2172 = vmatprep.mubr.bf16.mxu1 %v179_v6  ;;  %2840 = vmatprep.subr.bf16.mxu0 %v4529_v15 }
  0xeb   :  { %v5687_v21 = vpop.f32.mrb[0].mxu1  ;;  %1721 = vmatmul.mubr.bf16.gmra.mrb[12].mxu0 %v178_v17 }
  0xec   :  { %v5689_v23 = vpop.f32.mrb[1].mxu1  ;;  %1730 = vmatprep.mubr.bf16.mxu0 %v186_v18  ;;  %2841 = vmatpush1.bf16.msra.mxu0 %v4527_v20 }
  0xed   :  { %v5691_v24 = vpop.f32.mrb[2].mxu1  ;;  %2842 = vmatprep.subr.bf16.mxu0 %v4532_v22 }
  0xee   :  { %v5699_v27 = vpop.f32.mrb[3].mxu1 }
  0xf0   :  { %2173 = vmatmul.mubr.bf16.gmra.mrb[44].mxu1 %v178_v17  ;;  %2843 = vmatpush1.bf16.msra.mxu0 %v4530_v32 }
  0xf1   :  { %2182 = vmatprep.mubr.bf16.mxu1 %v186_v18  ;;  %2844 = vmatprep.subr.bf16.mxu0 %v4535_v33 }
  0xf3   :  { %v5707_v37 = vpop.f32.mrb[4].mxu1  ;;  %1731 = vmatmul.mubr.bf16.gmra.mrb[16].mxu0 %v185_v34 }
  0xf4   :  { %v5709_v39 = vpop.f32.mrb[5].mxu1  ;;  %1740 = vmatprep.mubr.bf16.mxu0 %v193_v35  ;;  %2845 = vmatpush1.bf16.msra.mxu0 %v4533_v36  ;;  %v4550_v36 = vld [vmem:[#allocation2 + $0xd4] ss:$8 sps:$4 sm:$0xff]  }
  0xf5   :  { %v5711_v40 = vpop.f32.mrb[6].mxu1  ;;  %2846 = vmatprep.subr.bf16.mxu0 %v4538_v38  ;;  %v4548_v38 = vld [vmem:[#allocation2 + $0xd0] ss:$8 sps:$4 sm:$0xff]  }
  0xf6   :  { %v5719_v44 = vpop.f32.mrb[7].mxu1 }
  0xf8   :  { %2183 = vmatmul.mubr.bf16.gmra.mrb[48].mxu1 %v185_v34  ;;  %2847 = vmatpush1.bf16.msra.mxu0 %v4536_v47 }
  0xf9   :  { %2192 = vmatprep.mubr.bf16.mxu1 %v193_v35  ;;  %2848 = vmatprep.subr.bf16.mxu0 %v4541_v48 }
  0xfb   :  { %v5727_v52 = vpop.f32.mrb[8].mxu1  ;;  %1741 = vmatmul.mubr.bf16.gmra.mrb[20].mxu0 %v192_v49 }
  0xfc   :  { %v5729_v55 = vpop.f32.mrb[9].mxu1  ;;  %1750 = vmatprep.mubr.bf16.mxu0 %v200_v50  ;;  %2849 = vmatpush1.bf16.msra.mxu0 %v4539_v51 }
  0xfd   :  { %v5731_v56 = vpop.f32.mrb[10].mxu1  ;;  %2850 = vmatprep.subr.bf16.mxu0 %v4544_v54 }
  0xfe   :  { %v5739_v59 = vpop.f32.mrb[11].mxu1 }
 0x100   :  { %2193 = vmatmul.mubr.bf16.gmra.mrb[52].mxu1 %v192_v49  ;;  %2851 = vmatpush1.bf16.msra.mxu0 %v4542_v62 }
 0x101   :  { %2202 = vmatprep.mubr.bf16.mxu1 %v200_v50  ;;  %2852 = vmatprep.subr.bf16.mxu0 %v4547_v63 }
 0x103   :  { %v5747_v5 = vpop.f32.mrb[12].mxu1  ;;  %1751 = vmatmul.mubr.bf16.gmra.mrb[24].mxu0 %v199_v2 }
 0x104   :  { %v5749_v6 = vpop.f32.mrb[13].mxu1  ;;  %1760 = vmatprep.mubr.bf16.mxu0 %v207_v3  ;;  %2853 = vmatpush1.bf16.msra.mxu0 %v4545_v4  ;;  %v4605_v4 = vld [vmem:[%s6270_s5 + $0x40] sm:$0xff]  }
 0x105   :  { %v5751_v7 = vpop.f32.mrb[14].mxu1  ;;  %2854 = vmatprep.subr.bf16.mxu0 %v4550_v36  ;;  %3827 = vmatprep.subr.bf16.mxu1 %v4605_v4 }
 0x106   :  { %v5759_v11 = vpop.f32.mrb[15].mxu1 }
 0x108   :  { %2203 = vmatmul.mubr.bf16.gmra.mrb[56].mxu1 %v199_v2  ;;  %2855 = vmatpush1.bf16.msra.mxu0 %v4548_v38 }
 0x109   :  { %2212 = vmatprep.mubr.bf16.mxu1 %v207_v3 }
 0x10b   :  { %v5761_v13 = vpop.f32.mrb[16].mxu1  ;;  %1761 = vmatmul.mubr.bf16.gmra.mrb[28].mxu0 %v206_v12 }
 0x10c   :  { %v5763_v14 = vpop.f32.mrb[17].mxu1 }
 0x10d   :  { %v5765_v15 = vpop.f32.mrb[18].mxu1 }
 0x10e   :  { %v5767_v17 = vpop.f32.mrb[19].mxu1 }
 0x110   :  { %2213 = vmatmul.mubr.bf16.gmra.mrb[60].mxu1 %v206_v12 }
 0x111   :  { %2255 = vmatprep.mubr.bf16.mxu1 %v4712_v0 }
 0x113   :  { %v5770_v18 = vpop.f32.mrb[20].mxu1 }
 0x114   :  { %v5772_v20 = vpop.f32.mrb[21].mxu1 }
 0x115   :  { %v5774_v22 = vpop.f32.mrb[22].mxu1 }
 0x116   :  { %v5776_v25 = vpop.f32.mrb[23].mxu1 }
 0x118   :  { %3738 = vmatmul.mubr.msk.bf16.vlgmr.msra.gmra.mrb[32].mxu1 %vm1407_vm0, %v4787_v8 }
 0x119   :  { %2265 = vmatprep.mubr.bf16.mxu1 %v4712_v0 }
 0x11b   :  { %v5781_v26 = vpop.f32.mrb[24].mxu1 }
 0x11c   :  { %v5783_v28 = vpop.f32.mrb[25].mxu1 }
 0x11d   :  { %v5785_v30 = vpop.f32.mrb[26].mxu1 }
 0x11e   :  { %v5787_v32 = vpop.f32.mrb[27].mxu1 }
 0x120   :  { %3739 = vmatmul.mubr.msk.bf16.gmra.mrb[36].mxu1 %vm1407_vm0, %v4822_v19  ;;  %v4553_v19 = vld [vmem:[#allocation2 + $0xe4] ss:$8 sps:$4 sm:$0xff]  }
 0x121   :  { %2275 = vmatprep.mubr.bf16.mxu1 %v4712_v0  ;;  %2856 = vmatprep.subr.bf16.mxu0 %v4553_v19 }
 0x122   :  { %2857 = vmatpush1.bf16.msra.mxu0 %v4551_v41 }
 0x123   :  { %v5792_v33 = vpop.f32.mrb[28].mxu1  ;;  %2858 = vmatprep.subr.bf16.mxu0 %v4556_v43  ;;  %v4557_v43 = vld [vmem:[#allocation2 + $0x100] ss:$8 sps:$4 sm:$0xff]  }
 0x124   :  { %v5794_v34 = vpop.f32.mrb[29].mxu1 }
 0x125   :  { %v5796_v8 = vpop.f32.mrb[30].mxu1 }
 0x126   :  { %v5798_v35 = vpop.f32.mrb[31].mxu1  ;;  %2859 = vmatpush1.bf16.msra.mxu0 %v4554_v45  ;;  %v4608_v45 = vld [vmem:[%s6270_s5 + $0x8] sm:$0xff]  }
 0x127   :  { %2941 = vmatprep.subr.bf16.mxu0 %v4559_v46 }
 0x128   :  { %3740 = vmatmul.mubr.msk.bf16.gmra.mrb[40].mxu1 %vm1407_vm0, %v4860_v31  ;;  %v407_v31 = vlaneseq }
 0x129   :  { %2285 = vmatprep.mubr.bf16.mxu1 %v4712_v0 }
 0x130   :  { %3741 = vmatmul.mubr.msk.bf16.gmra.mrb[44].mxu1 %vm1407_vm0, %v4895_v42  ;;  %v5818_v42 = vshrl.u32 %v407_v31, 7 }
 0x131   :  { %2295 = vmatprep.mubr.bf16.mxu1 %v4712_v0 }
 0x132   :  { %v413_v47 = vsub.s32 1, %v5818_v42 }
 0x138   :  { %3742 = vmatmul.mubr.msk.bf16.gmra.mrb[48].mxu1 %vm1407_vm0, %v4930_v53  ;;  %v409_v53 = vsub.s32 0, %v5818_v42 }
 0x139   :  { %2305 = vmatprep.mubr.bf16.mxu1 %v4712_v0 }
 0x140   :  { %3743 = vmatmul.mubr.msk.bf16.gmra.mrb[52].mxu1 %vm1407_vm0, %v4965_v1  ;;  %v5824_v1 = vld [vmem:[%s6267_s2] sm:$0xf] }
 0x141   :  { %2315 = vmatprep.mubr.bf16.mxu1 %v4712_v0 }
 0x148   :  { %3744 = vmatmul.mubr.msk.bf16.gmra.mrb[56].mxu1 %vm1407_vm0, %v5006_v16  ;;  %v5835_v16 = vrot.slane %v5824_v1, %v413_v47 }
 0x149   :  { %2325 = vmatprep.mubr.bf16.mxu1 %v4712_v0  ;;  %v5830_v0 = vrot.slane %v5824_v1, %v409_v53 }
 0x150   :  { %3745 = vmatmul.mubr.msk.bf16.gmra.mrb[60].mxu1 %vm1407_vm0, %v5044_v29 }
 0x1a6   :  { %v1692_v29 = vpop.f32.mrb[0].mxu0 }
 0x1a7   :  { %v3891_v48 = vadd.f32 %v1692_v29, %v5830_v0  ;;  %v1694_v49 = vpop.f32.mrb[1].mxu0 }
 0x1a8   :  { %v3893_v50 = vadd.f32 %v1694_v49, %v5835_v16  ;;  %v1696_v51 = vpop.f32.mrb[2].mxu0  ;;  %v4562_v49 = vld [vmem:[#allocation2 + $0x114] ss:$8 sps:$4 sm:$0xff]  }
 0x1a9   :  { %v3892_v54 = vadd.f32 %v3891_v48, %v5687_v21  ;;  %v3895_v57 = vadd.f32 %v1696_v51, %v5830_v0  ;;  %v1698_v58 = vpop.f32.mrb[3].mxu0  ;;  %v4606_v21 = vld [vmem:[%s6270_s5] sm:$0xff]  }
 0x1aa   :  { %v3894_v60 = vadd.f32 %v3893_v50, %v5689_v23  ;;  %v3897_v61 = vadd.f32 %v1698_v58, %v5835_v16  ;;  %v4607_v23 = vld [vmem:[%s6270_s5 + $0x48] sm:$0xff]   ;;  %3828 = vmatpush3.bf16.msra.mxu1 %v4606_v21  ;;  %v4609_v50 = vld [vmem:[%s6270_s5 + $0x50] sm:$0xff]  }
 0x1ab   :  { %v3896_v62 = vadd.f32 %v3895_v57, %v5691_v24  ;;  %v2336_v2 = vmax.f32 %v3892_v54, 0.0  ;;  %3829 = vmatprep.subr.bf16.mxu1 %v4607_v23 }
 0x1ac   :  { %v3898_v63 = vadd.f32 %v3897_v61, %v5699_v27  ;;  %v2337_v9 = vmax.f32 %v3894_v60, 0.0  ;;  %v4610_v60 = vld [vmem:[%s6270_s5 + $0x10] sm:$0xff]  }
 0x1ad   :  { %v2340_v3 = vmax.f32 %v3896_v62, 0.0 }
 0x1ae   :  { %v2341_v10 = vmax.f32 %v3898_v63, 0.0  ;;  %v1702_v12 = vpop.f32.mrb[4].mxu0  ;;  %3830 = vmatpush3.bf16.msra.mxu1 %v4608_v45  ;;  %v4565_v63 = vld [vmem:[#allocation2 + $0x124] ss:$8 sps:$4 sm:$0xff]  }
 0x1af   :  { %v2400_v24 = vpack.c.bf16 %v2340_v3, %v2336_v2  ;;  %v3899_v27 = vadd.f32 %v1702_v12, %v5830_v0  ;;  %v1704_v36 = vpop.f32.mrb[5].mxu0  ;;  %3831 = vmatprep.subr.bf16.mxu1 %v4609_v50  ;;  %v4563_v12 = vld [vmem:[#allocation2 + $0x120] ss:$8 sps:$4 sm:$0xff]  }
 0x1b0   :  { %v3901_v38 = vadd.f32 %v1704_v36, %v5835_v16  ;;  %v1706_v19 = vpop.f32.mrb[6].mxu0  ;;  %v2401_v41 = vpack.c.bf16 %v2341_v10, %v2337_v9 }
 0x1b1   :  { %v3900_v46 = vadd.f32 %v3899_v27, %v5707_v37  ;;  %v3903_v29 = vadd.f32 %v1706_v19, %v5830_v0  ;;  %v1708_v48 = vpop.f32.mrb[7].mxu0  ;;  %v4560_v37 = vld [vmem:[#allocation2 + $0x110] ss:$8 sps:$4 sm:$0xff]   ;;  %v4568_v19 = vld [vmem:[#allocation2 + $0x134] ss:$8 sps:$4 sm:$0xff]  }
 0x1b2   :  { %v3902_v51 = vadd.f32 %v3901_v38, %v5709_v39  ;;  %v3905_v54 = vadd.f32 %v1708_v48, %v5835_v16  ;;  %2860 = vmatprep.mubr.bf16.mxu0 %v2401_v41  ;;  %v4611_v39 = vld [vmem:[%s6270_s5 + $0x58] sm:$0xff]   ;;  %3832 = vmatpush3.bf16.msra.mxu1 %v4610_v60  ;;  %v4613_v41 = vld [vmem:[%s6270_s5 + $0x60] sm:$0xff]  }
 0x1b3   :  { %v3904_v57 = vadd.f32 %v3903_v29, %v5711_v40  ;;  %2861 = vmatmul.mubr.bf16.vlgmr.msra.gmra.mrb[32].mxu0 %v2400_v24  ;;  %v2344_v61 = vmax.f32 %v3900_v46, 0.0  ;;  %v4612_v24 = vld [vmem:[%s6270_s5 + $0x18] sm:$0xff]   ;;  %3833 = vmatprep.subr.bf16.mxu1 %v4611_v39  ;;  %v4614_v48 = vld [vmem:[%s6270_s5 + $0x20] sm:$0xff]   ;;  %v4616_v39 = vld [vmem:[%s6270_s5 + $0x28] sm:$0xff]  }
 0x1b4   :  { %v3906_v58 = vadd.f32 %v3905_v54, %v5719_v44  ;;  %2942 = vmatpush1.bf16.msra.mxu0 %v4557_v43  ;;  %v2345_v40 = vmax.f32 %v3902_v51, 0.0  ;;  %v4566_v29 = vld [vmem:[#allocation2 + $0x130] ss:$8 sps:$4 sm:$0xff]   ;;  %v4571_v51 = vld [vmem:[#allocation2 + $0x144] ss:$8 sps:$4 sm:$0xff]  }
 0x1b5   :  { %v2348_v62 = vmax.f32 %v3904_v57, 0.0  ;;  %2943 = vmatprep.subr.bf16.mxu0 %v4562_v49 }
 0x1b6   :  { %v2349_v2 = vmax.f32 %v3906_v58, 0.0  ;;  %v1712_v3 = vpop.f32.mrb[8].mxu0  ;;  %3834 = vmatpush3.bf16.msra.mxu1 %v4612_v24 }
 0x1b7   :  { %v3907_v44 = vadd.f32 %v1712_v3, %v5830_v0  ;;  %v1714_v4 = vpop.f32.mrb[9].mxu0  ;;  %v2404_v21 = vpack.c.bf16 %v2348_v62, %v2344_v61  ;;  %3835 = vmatprep.subr.bf16.mxu1 %v4613_v41 }
 0x1b8   :  { %v3909_v23 = vadd.f32 %v1714_v4, %v5835_v16  ;;  %v1716_v9 = vpop.f32.mrb[10].mxu0  ;;  %v2405_v10 = vpack.c.bf16 %v2349_v2, %v2345_v40  ;;  %2944 = vmatpush1.bf16.msra.mxu0 %v4560_v37  ;;  %v4617_v4 = vld [vmem:[%s6270_s5 + $0x70] sm:$0xff]  }
 0x1b9   :  { %v3908_v27 = vadd.f32 %v3907_v44, %v5727_v52  ;;  %v3911_v36 = vadd.f32 %v1716_v9, %v5830_v0  ;;  %v1718_v38 = vpop.f32.mrb[11].mxu0  ;;  %2945 = vmatprep.subr.bf16.mxu0 %v4565_v63  ;;  %v4569_v63 = vld [vmem:[#allocation2 + $0x140] ss:$8 sps:$4 sm:$0xff]   ;;  %v4574_v44 = vld [vmem:[#allocation2 + $0x154] ss:$8 sps:$4 sm:$0xff]  }
 0x1ba   :  { %v3910_v43 = vadd.f32 %v3909_v23, %v5729_v55  ;;  %v3913_v45 = vadd.f32 %v1718_v38, %v5835_v16  ;;  %2870 = vmatprep.mubr.bf16.mxu0 %v2405_v10  ;;  %v4615_v55 = vld [vmem:[%s6270_s5 + $0x68] sm:$0xff]   ;;  %3836 = vmatpush3.bf16.msra.mxu1 %v4614_v48  ;;  %v4572_v10 = vld [vmem:[#allocation2 + $0x150] ss:$8 sps:$4 sm:$0xff]  }
 0x1bb   :  { %v3912_v46 = vadd.f32 %v3911_v36, %v5731_v56  ;;  %2871 = vmatmul.mubr.bf16.gmra.mrb[36].mxu0 %v2404_v21  ;;  %v2352_v49 = vmax.f32 %v3908_v27, 0.0  ;;  %3837 = vmatprep.subr.bf16.mxu1 %v4615_v55  ;;  %v4577_v36 = vld [vmem:[#allocation2 + $0x164] ss:$8 sps:$4 sm:$0xff]  }
 0x1bc   :  { %v3914_v52 = vadd.f32 %v3913_v45, %v5739_v59  ;;  %2946 = vmatpush1.bf16.msra.mxu0 %v4563_v12  ;;  %v2353_v56 = vmax.f32 %v3910_v43, 0.0  ;;  %v4618_v12 = vld [vmem:[%s6270_s5 + $0x30] sm:$0xff]  }
 0x1bd   :  { %v2356_v50 = vmax.f32 %v3912_v46, 0.0  ;;  %2947 = vmatprep.subr.bf16.mxu0 %v4568_v19 }
 0x1be   :  { %v2357_v54 = vmax.f32 %v3914_v52, 0.0  ;;  %v1722_v57 = vpop.f32.mrb[12].mxu0  ;;  %3838 = vmatpush3.bf16.msra.mxu1 %v4616_v39  ;;  %v4575_v52 = vld [vmem:[#allocation2 + $0x160] ss:$8 sps:$4 sm:$0xff]  }
 0x1bf   :  { %v3915_v59 = vadd.f32 %v1722_v57, %v5830_v0  ;;  %v1724_v58 = vpop.f32.mrb[13].mxu0  ;;  %v2408_v37 = vpack.c.bf16 %v2356_v50, %v2352_v49  ;;  %3839 = vmatprep.subr.bf16.mxu1 %v4617_v4  ;;  %v4580_v50 = vld [vmem:[#allocation2 + $0x174] ss:$8 sps:$4 sm:$0xff]   ;;  %v4578_v57 = vld [vmem:[#allocation2 + $0x170] ss:$8 sps:$4 sm:$0xff]  }
 0x1c0   :  { %v3917_v60 = vadd.f32 %v1724_v58, %v5835_v16  ;;  %v1726_v61 = vpop.f32.mrb[14].mxu0  ;;  %v2409_v62 = vpack.c.bf16 %v2357_v54, %v2353_v56  ;;  %2948 = vmatpush1.bf16.msra.mxu0 %v4566_v29  ;;  %v4586_v4 = vld [vmem:[#allocation2 + $0x194] ss:$8 sps:$4 sm:$0xff]  }
 0x1c1   :  { %v3916_v40 = vadd.f32 %v3915_v59, %v5747_v5  ;;  %v3919_v2 = vadd.f32 %v1726_v61, %v5830_v0  ;;  %v1728_v3 = vpop.f32.mrb[15].mxu0  ;;  %2949 = vmatprep.subr.bf16.mxu0 %v4571_v51 }
 0x1c2   :  { %v3918_v21 = vadd.f32 %v3917_v60, %v5749_v6  ;;  %v3921_v23 = vadd.f32 %v1728_v3, %v5835_v16  ;;  %2880 = vmatprep.mubr.bf16.mxu0 %v2409_v62  ;;  %3840 = vmatpush3.bf16.msra.mxu1 %v4618_v12 }
 0x1c3   :  { %v3920_v9 = vadd.f32 %v3919_v2, %v5751_v7  ;;  %2881 = vmatmul.mubr.bf16.gmra.mrb[40].mxu0 %v2408_v37  ;;  %v2360_v24 = vmax.f32 %v3916_v40, 0.0  ;;  %v4581_v2 = vld [vmem:[#allocation2 + $0x180] ss:$8 sps:$4 sm:$0xff]  }
 0x1c4   :  { %v3922_v5 = vadd.f32 %v3921_v23, %v5759_v11  ;;  %2950 = vmatpush1.bf16.msra.mxu0 %v4569_v63  ;;  %v2361_v6 = vmax.f32 %v3918_v21, 0.0 }
 0x1c5   :  { %v2364_v27 = vmax.f32 %v3920_v9, 0.0  ;;  %2951 = vmatprep.subr.bf16.mxu0 %v4574_v44 }
 0x1c6   :  { %v2365_v38 = vmax.f32 %v3922_v5, 0.0  ;;  %v1732_v19 = vpop.f32.mrb[16].mxu0 }
 0x1c7   :  { %v3923_v7 = vadd.f32 %v1732_v19, %v5830_v0  ;;  %v1734_v41 = vpop.f32.mrb[17].mxu0  ;;  %v2412_v43 = vpack.c.bf16 %v2364_v27, %v2360_v24 }
 0x1c8   :  { %v3925_v11 = vadd.f32 %v1734_v41, %v5835_v16  ;;  %v1736_v45 = vpop.f32.mrb[18].mxu0  ;;  %v2413_v46 = vpack.c.bf16 %v2365_v38, %v2361_v6  ;;  %2952 = vmatpush1.bf16.msra.mxu0 %v4572_v10  ;;  %v4584_v10 = vld [vmem:[#allocation2 + $0x190] ss:$8 sps:$4 sm:$0xff]  }
 0x1c9   :  { %v3924_v29 = vadd.f32 %v3923_v7, %v5761_v13  ;;  %v3927_v48 = vadd.f32 %v1736_v45, %v5830_v0  ;;  %v1738_v49 = vpop.f32.mrb[19].mxu0  ;;  %2953 = vmatprep.subr.bf16.mxu0 %v4577_v36  ;;  %v4583_v13 = vld [vmem:[#allocation2 + $0x184] ss:$8 sps:$4 sm:$0xff]  }
 0x1ca   :  { %v3926_v51 = vadd.f32 %v3925_v11, %v5763_v14  ;;  %v3929_v55 = vadd.f32 %v1738_v49, %v5835_v16  ;;  %2890 = vmatprep.mubr.bf16.mxu0 %v2413_v46  ;;  %v4592_v46 = vld [vmem:[#allocation2 + $0x1b4] ss:$8 sps:$4 sm:$0xff]  }
 0x1cb   :  { %v3928_v56 = vadd.f32 %v3927_v48, %v5765_v15  ;;  %2891 = vmatmul.mubr.bf16.gmra.mrb[44].mxu0 %v2412_v43  ;;  %v2368_v59 = vmax.f32 %v3924_v29, 0.0  ;;  %v4587_v43 = vld [vmem:[#allocation2 + $0x1a0] ss:$8 sps:$4 sm:$0xff]  }
 0x1cc   :  { %v3930_v54 = vadd.f32 %v3929_v55, %v5767_v17  ;;  %2954 = vmatpush1.bf16.msra.mxu0 %v4575_v52  ;;  %v2369_v37 = vmax.f32 %v3926_v51, 0.0 }
 0x1cd   :  { %v2372_v58 = vmax.f32 %v3928_v56, 0.0  ;;  %2955 = vmatprep.subr.bf16.mxu0 %v4580_v50  ;;  %v4590_v50 = vld [vmem:[#allocation2 + $0x1b0] ss:$8 sps:$4 sm:$0xff]  }
 0x1ce   :  { %v2373_v60 = vmax.f32 %v3930_v54, 0.0  ;;  %v1742_v61 = vpop.f32.mrb[20].mxu0 }
 0x1cf   :  { %v3931_v62 = vadd.f32 %v1742_v61, %v5830_v0  ;;  %v1744_v14 = vpop.f32.mrb[21].mxu0  ;;  %v2416_v63 = vpack.c.bf16 %v2372_v58, %v2368_v59 }
 0x1d0   :  { %v3933_v39 = vadd.f32 %v1744_v14, %v5835_v16  ;;  %v1746_v40 = vpop.f32.mrb[22].mxu0  ;;  %v2417_v15 = vpack.c.bf16 %v2373_v60, %v2369_v37  ;;  %2956 = vmatpush1.bf16.msra.mxu0 %v4578_v57  ;;  %v4593_v60 = vld [vmem:[#allocation2 + $0x1c0] ss:$8 sps:$4 sm:$0xff]   ;;  %v4598_v14 = vld [vmem:[#allocation2 + $0x1d4] ss:$8 sps:$4 sm:$0xff]  }
 0x1d1   :  { %v3932_v17 = vadd.f32 %v3931_v62, %v5770_v18  ;;  %v3935_v3 = vadd.f32 %v1746_v40, %v5830_v0  ;;  %v1748_v44 = vpop.f32.mrb[23].mxu0  ;;  %2957 = vmatprep.subr.bf16.mxu0 %v4583_v13  ;;  %v4589_v18 = vld [vmem:[#allocation2 + $0x1a4] ss:$8 sps:$4 sm:$0xff]  }
 0x1d2   :  { %v3934_v21 = vadd.f32 %v3933_v39, %v5772_v20  ;;  %v3937_v23 = vadd.f32 %v1748_v44, %v5835_v16  ;;  %2900 = vmatprep.mubr.bf16.mxu0 %v2417_v15  ;;  %v417_v15 = vsub.s32 2, %v5818_v42  ;;  %v4601_v44 = vld [vmem:[#allocation2 + $0x1e4] ss:$8 sps:$4 sm:$0xff]  }
 0x1d3   :  { %v3936_v9 = vadd.f32 %v3935_v3, %v5774_v22  ;;  %2901 = vmatmul.mubr.bf16.gmra.mrb[48].mxu0 %v2416_v63  ;;  %v2376_v12 = vmax.f32 %v3932_v17, 0.0  ;;  %v4596_v17 = vld [vmem:[#allocation2 + $0x1d0] ss:$8 sps:$4 sm:$0xff]  }
 0x1d4   :  { %v3938_v5 = vadd.f32 %v3937_v23, %v5776_v25  ;;  %2958 = vmatpush1.bf16.msra.mxu0 %v4581_v2  ;;  %v2377_v27 = vmax.f32 %v3934_v21, 0.0 }
 0x1d5   :  { %v2380_v24 = vmax.f32 %v3936_v9, 0.0  ;;  %2959 = vmatprep.subr.bf16.mxu0 %v4586_v4  ;;  %v4604_v9 = vld [vmem:[#allocation2 + $0x1f4] ss:$8 sps:$4 sm:$0xff]  }
 0x1d6   :  { %v2381_v36 = vmax.f32 %v3938_v5, 0.0  ;;  %v1752_v6 = vpop.f32.mrb[24].mxu0 }
 0x1d7   :  { %v3939_v38 = vadd.f32 %v1752_v6, %v5830_v0  ;;  %v1754_v20 = vpop.f32.mrb[25].mxu0  ;;  %v2420_v19 = vpack.c.bf16 %v2380_v24, %v2376_v12 }
 0x1d8   :  { %v3941_v7 = vadd.f32 %v1754_v20, %v5835_v16  ;;  %v1756_v41 = vpop.f32.mrb[26].mxu0  ;;  %v2421_v22 = vpack.c.bf16 %v2381_v36, %v2377_v27  ;;  %2960 = vmatpush1.bf16.msra.mxu0 %v4584_v10  ;;  %v4602_v27 = vld [vmem:[#allocation2 + $0x1f0] ss:$8 sps:$4 sm:$0xff]  }
 0x1d9   :  { %v3940_v25 = vadd.f32 %v3939_v38, %v5781_v26  ;;  %v3943_v11 = vadd.f32 %v1756_v41, %v5830_v0  ;;  %v1758_v45 = vpop.f32.mrb[27].mxu0  ;;  %2961 = vmatprep.subr.bf16.mxu0 %v4589_v18  ;;  %v4595_v26 = vld [vmem:[#allocation2 + $0x1c4] ss:$8 sps:$4 sm:$0xff]  }
 0x1da   :  { %v3942_v52 = vadd.f32 %v3941_v7, %v5783_v28  ;;  %v3945_v29 = vadd.f32 %v1758_v45, %v5835_v16  ;;  %2910 = vmatprep.mubr.bf16.mxu0 %v2421_v22 }
 0x1db   :  { %v3944_v48 = vadd.f32 %v3943_v11, %v5785_v30  ;;  %2911 = vmatmul.mubr.bf16.gmra.mrb[52].mxu0 %v2420_v19  ;;  %v2384_v51 = vmax.f32 %v3940_v25, 0.0 }
 0x1dc   :  { %v3946_v49 = vadd.f32 %v3945_v29, %v5787_v32  ;;  %2962 = vmatpush1.bf16.msra.mxu0 %v4587_v43  ;;  %v2385_v56 = vmax.f32 %v3942_v52, 0.0 }
 0x1dd   :  { %v2388_v55 = vmax.f32 %v3944_v48, 0.0  ;;  %2963 = vmatprep.subr.bf16.mxu0 %v4592_v46 }
 0x1de   :  { %v2389_v54 = vmax.f32 %v3946_v49, 0.0  ;;  %v1762_v57 = vpop.f32.mrb[28].mxu0 }
 0x1df   :  { %v3947_v59 = vadd.f32 %v1762_v57, %v5830_v0  ;;  %v1764_v28 = vpop.f32.mrb[29].mxu0  ;;  %v2424_v58 = vpack.c.bf16 %v2388_v55, %v2384_v51 }
 0x1e0   :  { %v3949_v13 = vadd.f32 %v1764_v28, %v5835_v16  ;;  %v1766_v37 = vpop.f32.mrb[30].mxu0  ;;  %v2425_v30 = vpack.c.bf16 %v2389_v54, %v2385_v56  ;;  %2964 = vmatpush1.bf16.msra.mxu0 %v4590_v50 }
 0x1e1   :  { %v3948_v32 = vadd.f32 %v3947_v59, %v5792_v33  ;;  %v3951_v61 = vadd.f32 %v1766_v37, %v5830_v0  ;;  %v1768_v62 = vpop.f32.mrb[31].mxu0  ;;  %2965 = vmatprep.subr.bf16.mxu0 %v4595_v26  ;;  %v421_v33 = vsub.s32 3, %v5818_v42 }
 0x1e2   :  { %v3950_v63 = vadd.f32 %v3949_v13, %v5794_v34  ;;  %v3953_v39 = vadd.f32 %v1768_v62, %v5835_v16  ;;  %2920 = vmatprep.mubr.bf16.mxu0 %v2425_v30  ;;  %v5946_v16 = vrot.slane %v5824_v1, %v417_v15 }
 0x1e3   :  { %v3952_v40 = vadd.f32 %v3951_v61, %v5796_v8  ;;  %2921 = vmatmul.mubr.bf16.gmra.mrb[56].mxu0 %v2424_v58  ;;  %v2392_v0 = vmax.f32 %v3948_v32, 0.0  ;;  %v5949_v23 = vrot.slane %v5824_v1, %v421_v33 }
 0x1e4   :  { %v3954_v2 = vadd.f32 %v3953_v39, %v5798_v35  ;;  %2966 = vmatpush1.bf16.msra.mxu0 %v4593_v60  ;;  %v2393_v4 = vmax.f32 %v3950_v63, 0.0  ;;  %v4599_v35 = vld [vmem:[#allocation2 + $0x1e0] ss:$8 sps:$4 sm:$0xff]  }
 0x1e5   :  { %v2396_v3 = vmax.f32 %v3952_v40, 0.0  ;;  %2967 = vmatprep.subr.bf16.mxu0 %v4598_v14 }
 0x1e6   :  { %v2397_v34 = vmax.f32 %v3954_v2, 0.0 }
 0x1e7   :  { %v2428_v21 = vpack.c.bf16 %v2396_v3, %v2392_v0 }
 0x1e8   :  { %v2429_v8 = vpack.c.bf16 %v2397_v34, %v2393_v4  ;;  %2968 = vmatpush1.bf16.msra.mxu0 %v4596_v17 }
 0x1e9   :  { %2969 = vmatprep.subr.bf16.mxu0 %v4601_v44 }
 0x1ea   :  { %2930 = vmatprep.mubr.bf16.mxu0 %v2429_v8 }
 0x1eb   :  { %v2257_v5 = vpop.f32.mrb[32].mxu1  ;;  %2931 = vmatmul.mubr.bf16.gmra.mrb[60].mxu0 %v2428_v21 }
 0x1ec   :  { %v3955_v10 = vadd.f32 %v2257_v5, %v5946_v16  ;;  %v2259_v12 = vpop.f32.mrb[33].mxu1  ;;  %2970 = vmatpush1.bf16.msra.mxu0 %v4599_v35 }
 0x1ed   :  { %v3956_v24 = vadd.f32 %v2259_v12, %v5949_v23  ;;  %v2261_v18 = vpop.f32.mrb[34].mxu1  ;;  %2971 = vmatprep.subr.bf16.mxu0 %v4604_v9 }
 0x1ee   :  { %v3957_v36 = vadd.f32 %v2261_v18, %v5946_v16  ;;  %v2263_v6 = vpop.f32.mrb[35].mxu1  ;;  %v2338_v38 = vmax.f32 %v3955_v10, 0.0 }
 0x1ef   :  { %v3958_v1 = vadd.f32 %v2263_v6, %v5949_v23  ;;  %v2339_v19 = vmax.f32 %v3956_v24, 0.0 }
 0x1f0   :  { %v2342_v20 = vmax.f32 %v3957_v36, 0.0  ;;  %2972 = vmatpush1.bf16.msra.mxu0 %v4602_v27 }
 0x1f1   :  { %v2343_v7 = vmax.f32 %v3958_v1, 0.0 }
 0x1f2   :  { %v2402_v41 = vpack.c.bf16 %v2342_v20, %v2338_v38 }
 0x1f3   :  { %v2403_v22 = vpack.c.bf16 %v2343_v7, %v2339_v19  ;;  %v2267_v43 = vpop.f32.mrb[36].mxu1 }
 0x1f4   :  { %v3959_v25 = vadd.f32 %v2267_v43, %v5946_v16  ;;  %v2269_v11 = vpop.f32.mrb[37].mxu1 }
 0x1f5   :  { %v3960_v45 = vadd.f32 %v2269_v11, %v5949_v23  ;;  %v2271_v46 = vpop.f32.mrb[38].mxu1  ;;  %2973 = vmatprep.mubr.bf16.mxu0 %v2403_v22 }
 0x1f6   :  { %v3961_v52 = vadd.f32 %v2271_v46, %v5946_v16  ;;  %v2273_v29 = vpop.f32.mrb[39].mxu1  ;;  %2974 = vmatmul.mubr.bf16.vlgmr.msra.gmra.mrb[32].mxu0 %v2402_v41  ;;  %v2346_v49 = vmax.f32 %v3959_v25, 0.0 }
 0x1f7   :  { %v3962_v48 = vadd.f32 %v2273_v29, %v5949_v23  ;;  %v2347_v51 = vmax.f32 %v3960_v45, 0.0 }
 0x1f8   :  { %v2350_v50 = vmax.f32 %v3961_v52, 0.0 }
 0x1f9   :  { %v2351_v55 = vmax.f32 %v3962_v48, 0.0 }
 0x1fa   :  { %v2406_v26 = vpack.c.bf16 %v2350_v50, %v2346_v49 }
 0x1fb   :  { %v2407_v56 = vpack.c.bf16 %v2351_v55, %v2347_v51  ;;  %v2277_v54 = vpop.f32.mrb[40].mxu1 }
 0x1fc   :  { %v3963_v57 = vadd.f32 %v2277_v54, %v5946_v16  ;;  %v2279_v59 = vpop.f32.mrb[41].mxu1 }
 0x1fd   :  { %v3964_v28 = vadd.f32 %v2279_v59, %v5949_v23  ;;  %v2281_v58 = vpop.f32.mrb[42].mxu1  ;;  %2983 = vmatprep.mubr.bf16.mxu0 %v2407_v56 }
 0x1fe   :  { %v3965_v13 = vadd.f32 %v2281_v58, %v5946_v16  ;;  %v2283_v37 = vpop.f32.mrb[43].mxu1  ;;  %2984 = vmatmul.mubr.bf16.gmra.mrb[36].mxu0 %v2406_v26  ;;  %v2354_v60 = vmax.f32 %v3963_v57, 0.0 }
 0x1ff   :  { %v3966_v30 = vadd.f32 %v2283_v37, %v5949_v23  ;;  %v2355_v61 = vmax.f32 %v3964_v28, 0.0 }
 0x200   :  { %v2358_v32 = vmax.f32 %v3965_v13, 0.0 }
 0x201   :  { %v2359_v62 = vmax.f32 %v3966_v30, 0.0 }
 0x202   :  { %v2410_v14 = vpack.c.bf16 %v2358_v32, %v2354_v60 }
 0x203   :  { %v2411_v63 = vpack.c.bf16 %v2359_v62, %v2355_v61  ;;  %v2287_v39 = vpop.f32.mrb[44].mxu1 }
 0x204   :  { %v3967_v40 = vadd.f32 %v2287_v39, %v5946_v16  ;;  %v2289_v15 = vpop.f32.mrb[45].mxu1 }
 0x205   :  { %v3968_v2 = vadd.f32 %v2289_v15, %v5949_v23  ;;  %v2291_v17 = vpop.f32.mrb[46].mxu1  ;;  %2993 = vmatprep.mubr.bf16.mxu0 %v2411_v63 }
 0x206   :  { %v3969_v33 = vadd.f32 %v2291_v17, %v5946_v16  ;;  %v2293_v0 = vpop.f32.mrb[47].mxu1  ;;  %2994 = vmatmul.mubr.bf16.gmra.mrb[40].mxu0 %v2410_v14  ;;  %v2362_v44 = vmax.f32 %v3967_v40, 0.0 }
 0x207   :  { %v3970_v3 = vadd.f32 %v2293_v0, %v5949_v23  ;;  %v2363_v34 = vmax.f32 %v3968_v2, 0.0 }
 0x208   :  { %v2366_v4 = vmax.f32 %v3969_v33, 0.0 }
 0x209   :  { %v2367_v21 = vmax.f32 %v3970_v3, 0.0 }
 0x20a   :  { %v2414_v8 = vpack.c.bf16 %v2366_v4, %v2362_v44 }
 0x20b   :  { %v2415_v35 = vpack.c.bf16 %v2367_v21, %v2363_v34  ;;  %v2297_v9 = vpop.f32.mrb[48].mxu1 }
 0x20c   :  { %v3971_v5 = vadd.f32 %v2297_v9, %v5946_v16  ;;  %v2299_v10 = vpop.f32.mrb[49].mxu1 }
 0x20d   :  { %v3972_v12 = vadd.f32 %v2299_v10, %v5949_v23  ;;  %v2301_v24 = vpop.f32.mrb[50].mxu1  ;;  %3003 = vmatprep.mubr.bf16.mxu0 %v2415_v35 }
 0x20e   :  { %v3973_v18 = vadd.f32 %v2301_v24, %v5946_v16  ;;  %v2303_v27 = vpop.f32.mrb[51].mxu1  ;;  %3004 = vmatmul.mubr.bf16.gmra.mrb[44].mxu0 %v2414_v8  ;;  %v2370_v6 = vmax.f32 %v3971_v5, 0.0  ;;  %v4619_v8 = vld [vmem:[%s6270_s5 + $0x78] sm:$0xff]  }
 0x20f   :  { %v3974_v36 = vadd.f32 %v2303_v27, %v5949_v23  ;;  %v2371_v38 = vmax.f32 %v3972_v12, 0.0  ;;  %3841 = vmatprep.subr.bf16.mxu1 %v4619_v8 }
 0x210   :  { %v2374_v1 = vmax.f32 %v3973_v18, 0.0 }
 0x211   :  { %v2375_v20 = vmax.f32 %v3974_v36, 0.0 }
 0x212   :  { %v2418_v19 = vpack.c.bf16 %v2374_v1, %v2370_v6 }
 0x213   :  { %v2419_v7 = vpack.c.bf16 %v2375_v20, %v2371_v38  ;;  %v2307_v41 = vpop.f32.mrb[52].mxu1 }
 0x214   :  { %v3975_v22 = vadd.f32 %v2307_v41, %v5946_v16  ;;  %v2309_v43 = vpop.f32.mrb[53].mxu1 }
 0x215   :  { %v3976_v25 = vadd.f32 %v2309_v43, %v5949_v23  ;;  %v2311_v11 = vpop.f32.mrb[54].mxu1  ;;  %3013 = vmatprep.mubr.bf16.mxu0 %v2419_v7 }
 0x216   :  { %v3977_v45 = vadd.f32 %v2311_v11, %v5946_v16  ;;  %v2313_v46 = vpop.f32.mrb[55].mxu1  ;;  %3014 = vmatmul.mubr.bf16.gmra.mrb[48].mxu0 %v2418_v19  ;;  %v2378_v29 = vmax.f32 %v3975_v22, 0.0 }
 0x217   :  { %v3978_v52 = vadd.f32 %v2313_v46, %v5949_v23  ;;  %v2379_v49 = vmax.f32 %v3976_v25, 0.0 }
 0x218   :  { %v2382_v48 = vmax.f32 %v3977_v45, 0.0 }
 0x219   :  { %v2383_v50 = vmax.f32 %v3978_v52, 0.0 }
 0x21a   :  { %v2422_v51 = vpack.c.bf16 %v2382_v48, %v2378_v29 }
 0x21b   :  { %v2423_v55 = vpack.c.bf16 %v2383_v50, %v2379_v49  ;;  %v2317_v26 = vpop.f32.mrb[56].mxu1 }
 0x21c   :  { %v3979_v56 = vadd.f32 %v2317_v26, %v5946_v16  ;;  %v2319_v54 = vpop.f32.mrb[57].mxu1 }
 0x21d   :  { %v3980_v57 = vadd.f32 %v2319_v54, %v5949_v23  ;;  %v2321_v59 = vpop.f32.mrb[58].mxu1  ;;  %3023 = vmatprep.mubr.bf16.mxu0 %v2423_v55 }
 0x21e   :  { %v3981_v28 = vadd.f32 %v2321_v59, %v5946_v16  ;;  %v2323_v58 = vpop.f32.mrb[59].mxu1  ;;  %3024 = vmatmul.mubr.bf16.gmra.mrb[52].mxu0 %v2422_v51  ;;  %v2386_v37 = vmax.f32 %v3979_v56, 0.0 }
 0x21f   :  { %v3982_v13 = vadd.f32 %v2323_v58, %v5949_v23  ;;  %v2387_v60 = vmax.f32 %v3980_v57, 0.0 }
 0x220   :  { %v2390_v30 = vmax.f32 %v3981_v28, 0.0 }
 0x221   :  { %v2391_v32 = vmax.f32 %v3982_v13, 0.0 }
 0x222   :  { %v2426_v61 = vpack.c.bf16 %v2390_v30, %v2386_v37 }
 0x223   :  { %v2427_v62 = vpack.c.bf16 %v2391_v32, %v2387_v60  ;;  %v2327_v14 = vpop.f32.mrb[60].mxu1 }
 0x224   :  { %v3983_v63 = vadd.f32 %v2327_v14, %v5946_v16  ;;  %v2329_v39 = vpop.f32.mrb[61].mxu1 }
 0x225   :  { %v3984_v40 = vadd.f32 %v2329_v39, %v5949_v23  ;;  %v2331_v15 = vpop.f32.mrb[62].mxu1  ;;  %3033 = vmatprep.mubr.bf16.mxu0 %v2427_v62 }
 0x226   :  { %v3985_v2 = vadd.f32 %v2331_v15, %v5946_v16  ;;  %v2333_v17 = vpop.f32.mrb[63].mxu1  ;;  %3034 = vmatmul.mubr.bf16.gmra.mrb[56].mxu0 %v2426_v61  ;;  %v2394_v0 = vmax.f32 %v3983_v63, 0.0  ;;  %v4620_v16 = vld [vmem:[%s6270_s5 + $0x38] sm:$0xff]  }
 0x227   :  { %v3986_v33 = vadd.f32 %v2333_v17, %v5949_v23  ;;  %v2395_v44 = vmax.f32 %v3984_v40, 0.0  ;;  %3842 = vmatpush3.bf16.msra.mxu1 %v4620_v16  ;;  %v2496_v23 = vld [vmem:[%s6269_s4] sm:$0x3] }
 0x228   :  { %v2398_v3 = vmax.f32 %v3985_v2, 0.0  ;;  %v5994_v35 = vrot.slane %v2496_v23, %v409_v53  ;;  %v5998_v9 = vrot.slane %v2496_v23, %v413_v47 }
 0x229   :  { %v2399_v4 = vmax.f32 %v3986_v33, 0.0 }
 0x22a   :  { %v2430_v34 = vpack.c.bf16 %v2398_v3, %v2394_v0 }
 0x22b   :  { %v2431_v21 = vpack.c.bf16 %v2399_v4, %v2395_v44 }
 0x22d   :  { %3043 = vmatprep.mubr.bf16.mxu0 %v2431_v21 }
 0x22e   :  { %3044 = vmatmul.mubr.bf16.gmra.mrb[60].mxu0 %v2430_v34 }
 0x2c9   :  { %v2975_v5 = vpop.f32.mrb[32].mxu0 }
 0x2ca   :  { %v3987_v10 = vadd.f32 %v2975_v5, %v5994_v35  ;;  %v2977_v12 = vpop.f32.mrb[33].mxu0 }
 0x2cb   :  { %v3988_v24 = vadd.f32 %v2977_v12, %v5998_v9  ;;  %v2979_v18 = vpop.f32.mrb[34].mxu0 }
 0x2cc   :  { %v3989_v27 = vadd.f32 %v2979_v18, %v5994_v35  ;;  %v2981_v36 = vpop.f32.mrb[35].mxu0  ;;  %v3054_v1 = vmax.f32 %v3987_v10, 0.0 }
 0x2cd   :  { %v3990_v6 = vadd.f32 %v2981_v36, %v5998_v9  ;;  %v3055_v53 = vmax.f32 %v3988_v24, 0.0 }
 0x2ce   :  { %v3056_v38 = vmax.f32 %v3989_v27, 0.0 }
 0x2cf   :  { %v3057_v20 = vmax.f32 %v3990_v6, 0.0 }
 0x2d0   :  { %v3086_v19 = vpack.c.bf16 %v3056_v38, %v3054_v1 }
 0x2d1   :  { %v3087_v42 = vpack.c.bf16 %v3057_v20, %v3055_v53  ;;  %v2985_v47 = vpop.f32.mrb[36].mxu0 }
 0x2d2   :  { %v3991_v7 = vadd.f32 %v2985_v47, %v5994_v35  ;;  %v2987_v41 = vpop.f32.mrb[37].mxu0 }
 0x2d3   :  { %v3992_v22 = vadd.f32 %v2987_v41, %v5998_v9  ;;  %v2989_v43 = vpop.f32.mrb[38].mxu0  ;;  %3269 = vmatprep.mubr.bf16.mxu1 %v3087_v42 }
 0x2d4   :  { %v3993_v25 = vadd.f32 %v2989_v43, %v5994_v35  ;;  %v2991_v11 = vpop.f32.mrb[39].mxu0  ;;  %3270 = vmatmul.mubr.bf16.vlgmr.msra.gmra.mrb[64].mxu1 %v3086_v19  ;;  %v3058_v46 = vmax.f32 %v3991_v7, 0.0 }
 0x2d5   :  { %v3994_v45 = vadd.f32 %v2991_v11, %v5998_v9  ;;  %v3059_v29 = vmax.f32 %v3992_v22, 0.0 }
 0x2d6   :  { %v3060_v52 = vmax.f32 %v3993_v25, 0.0 }
 0x2d7   :  { %v3061_v48 = vmax.f32 %v3994_v45, 0.0 }
 0x2d8   :  { %v3088_v49 = vpack.c.bf16 %v3060_v52, %v3058_v46 }
 0x2d9   :  { %v3089_v50 = vpack.c.bf16 %v3061_v48, %v3059_v29  ;;  %v2995_v51 = vpop.f32.mrb[40].mxu0 }
 0x2da   :  { %v3995_v55 = vadd.f32 %v2995_v51, %v5994_v35  ;;  %v2997_v26 = vpop.f32.mrb[41].mxu0 }
 0x2db   :  { %v3996_v56 = vadd.f32 %v2997_v26, %v5998_v9  ;;  %v2999_v54 = vpop.f32.mrb[42].mxu0  ;;  %3277 = vmatprep.mubr.bf16.mxu1 %v3089_v50 }
 0x2dc   :  { %v3997_v57 = vadd.f32 %v2999_v54, %v5994_v35  ;;  %v3001_v59 = vpop.f32.mrb[43].mxu0  ;;  %3278 = vmatmul.mubr.bf16.gmra.mrb[68].mxu1 %v3088_v49  ;;  %v3062_v58 = vmax.f32 %v3995_v55, 0.0 }
 0x2dd   :  { %v3998_v28 = vadd.f32 %v3001_v59, %v5998_v9  ;;  %v3063_v37 = vmax.f32 %v3996_v56, 0.0 }
 0x2de   :  { %v3064_v13 = vmax.f32 %v3997_v57, 0.0 }
 0x2df   :  { %v3065_v30 = vmax.f32 %v3998_v28, 0.0 }
 0x2e0   :  { %v3090_v60 = vpack.c.bf16 %v3064_v13, %v3062_v58 }
 0x2e1   :  { %v3091_v32 = vpack.c.bf16 %v3065_v30, %v3063_v37  ;;  %v3005_v61 = vpop.f32.mrb[44].mxu0 }
 0x2e2   :  { %v3999_v62 = vadd.f32 %v3005_v61, %v5994_v35  ;;  %v3007_v14 = vpop.f32.mrb[45].mxu0 }
 0x2e3   :  { %v4000_v63 = vadd.f32 %v3007_v14, %v5998_v9  ;;  %v3009_v39 = vpop.f32.mrb[46].mxu0  ;;  %3285 = vmatprep.mubr.bf16.mxu1 %v3091_v32 }
 0x2e4   :  { %v4001_v40 = vadd.f32 %v3009_v39, %v5994_v35  ;;  %v3011_v15 = vpop.f32.mrb[47].mxu0  ;;  %3286 = vmatmul.mubr.bf16.gmra.mrb[72].mxu1 %v3090_v60  ;;  %v3066_v17 = vmax.f32 %v3999_v62, 0.0 }
 0x2e5   :  { %v4002_v2 = vadd.f32 %v3011_v15, %v5998_v9  ;;  %v3067_v0 = vmax.f32 %v4000_v63, 0.0 }
 0x2e6   :  { %v3068_v33 = vmax.f32 %v4001_v40, 0.0 }
 0x2e7   :  { %v3069_v3 = vmax.f32 %v4002_v2, 0.0 }
 0x2e8   :  { %v3092_v44 = vpack.c.bf16 %v3068_v33, %v3066_v17  ;;  %v6033_v33 = vand.u32 127, %v407_v31 }
 0x2e9   :  { %v3093_v4 = vpack.c.bf16 %v3069_v3, %v3067_v0  ;;  %v3015_v34 = vpop.f32.mrb[48].mxu0 }
 0x2ea   :  { %v4003_v21 = vadd.f32 %v3015_v34, %v5994_v35  ;;  %v3017_v8 = vpop.f32.mrb[49].mxu0  ;;  %vm3336_vm1 = vcmp.lt.s32.totalorder %v6033_v33, 10 }
 0x2eb   :  { %v4004_v16 = vadd.f32 %v3017_v8, %v5998_v9  ;;  %v3019_v23 = vpop.f32.mrb[50].mxu0  ;;  %3293 = vmatprep.mubr.bf16.mxu1 %v3093_v4 }
 0x2ec   :  { %v4005_v5 = vadd.f32 %v3019_v23, %v5994_v35  ;;  %v3021_v10 = vpop.f32.mrb[51].mxu0  ;;  %3294 = vmatmul.mubr.bf16.gmra.mrb[76].mxu1 %v3092_v44  ;;  %v3070_v24 = vmax.f32 %v4003_v21, 0.0 }
 0x2ed   :  { %v4006_v12 = vadd.f32 %v3021_v10, %v5998_v9  ;;  %v3071_v27 = vmax.f32 %v4004_v16, 0.0 }
 0x2ee   :  { %v3072_v18 = vmax.f32 %v4005_v5, 0.0 }
 0x2ef   :  { %v3073_v36 = vmax.f32 %v4006_v12, 0.0 }
 0x2f0   :  { %v3094_v6 = vpack.c.bf16 %v3072_v18, %v3070_v24 }
 0x2f1   :  { %v3095_v1 = vpack.c.bf16 %v3073_v36, %v3071_v27  ;;  %v3025_v38 = vpop.f32.mrb[52].mxu0 }
 0x2f2   :  { %v4007_v53 = vadd.f32 %v3025_v38, %v5994_v35  ;;  %v3027_v20 = vpop.f32.mrb[53].mxu0 }
 0x2f3   :  { %v4008_v19 = vadd.f32 %v3027_v20, %v5998_v9  ;;  %v3029_v42 = vpop.f32.mrb[54].mxu0  ;;  %3301 = vmatprep.mubr.bf16.mxu1 %v3095_v1 }
 0x2f4   :  { %v4009_v47 = vadd.f32 %v3029_v42, %v5994_v35  ;;  %v3031_v7 = vpop.f32.mrb[55].mxu0  ;;  %3302 = vmatmul.mubr.bf16.gmra.mrb[80].mxu1 %v3094_v6  ;;  %v3074_v22 = vmax.f32 %v4007_v53, 0.0 }
 0x2f5   :  { %v4010_v41 = vadd.f32 %v3031_v7, %v5998_v9  ;;  %v3075_v25 = vmax.f32 %v4008_v19, 0.0 }
 0x2f6   :  { %v3076_v43 = vmax.f32 %v4009_v47, 0.0 }
 0x2f7   :  { %v3077_v11 = vmax.f32 %v4010_v41, 0.0 }
 0x2f8   :  { %v3096_v45 = vpack.c.bf16 %v3076_v43, %v3074_v22 }
 0x2f9   :  { %v3097_v46 = vpack.c.bf16 %v3077_v11, %v3075_v25  ;;  %v3035_v52 = vpop.f32.mrb[56].mxu0 }
 0x2fa   :  { %v4011_v29 = vadd.f32 %v3035_v52, %v5994_v35  ;;  %v3037_v48 = vpop.f32.mrb[57].mxu0 }
 0x2fb   :  { %v4012_v49 = vadd.f32 %v3037_v48, %v5998_v9  ;;  %v3039_v50 = vpop.f32.mrb[58].mxu0  ;;  %3309 = vmatprep.mubr.bf16.mxu1 %v3097_v46 }
 0x2fc   :  { %v4013_v51 = vadd.f32 %v3039_v50, %v5994_v35  ;;  %v3041_v55 = vpop.f32.mrb[59].mxu0  ;;  %3310 = vmatmul.mubr.bf16.gmra.mrb[84].mxu1 %v3096_v45  ;;  %v3078_v56 = vmax.f32 %v4011_v29, 0.0 }
 0x2fd   :  { %v4014_v26 = vadd.f32 %v3041_v55, %v5998_v9  ;;  %v3079_v57 = vmax.f32 %v4012_v49, 0.0 }
 0x2fe   :  { %v3080_v54 = vmax.f32 %v4013_v51, 0.0 }
 0x2ff   :  { %v3081_v59 = vmax.f32 %v4014_v26, 0.0 }
 0x300   :  { %v3098_v28 = vpack.c.bf16 %v3080_v54, %v3078_v56 }
 0x301   :  { %v3099_v58 = vpack.c.bf16 %v3081_v59, %v3079_v57  ;;  %v3045_v13 = vpop.f32.mrb[60].mxu0 }
 0x302   :  { %v4015_v37 = vadd.f32 %v3045_v13, %v5994_v35  ;;  %v3047_v30 = vpop.f32.mrb[61].mxu0 }
 0x303   :  { %v4016_v60 = vadd.f32 %v3047_v30, %v5998_v9  ;;  %v3049_v32 = vpop.f32.mrb[62].mxu0  ;;  %3317 = vmatprep.mubr.bf16.mxu1 %v3099_v58 }
 0x304   :  { %v4017_v61 = vadd.f32 %v3049_v32, %v5994_v35  ;;  %v3051_v62 = vpop.f32.mrb[63].mxu0  ;;  %3318 = vmatmul.mubr.bf16.gmra.mrb[88].mxu1 %v3098_v28  ;;  %v3082_v63 = vmax.f32 %v4015_v37, 0.0  ;;  %v6038_v35 = vld [vmem:[%s6271_s6] ss:$0 sm:$0xff] }
 0x305   :  { %v4018_v14 = vadd.f32 %v3051_v62, %v5998_v9  ;;  %v3083_v40 = vmax.f32 %v4016_v60, 0.0 }
 0x306   :  { %v3084_v39 = vmax.f32 %v4017_v61, 0.0 }
 0x307   :  { %v3085_v15 = vmax.f32 %v4018_v14, 0.0 }
 0x308   :  { %v3100_v2 = vpack.c.bf16 %v3084_v39, %v3082_v63 }
 0x309   :  { %v3101_v17 = vpack.c.bf16 %v3085_v15, %v3083_v40 }
 0x30b   :  { %3325 = vmatprep.mubr.bf16.mxu1 %v3101_v17 }
 0x30c   :  { %3326 = vmatmul.mubr.bf16.gmra.mrb[92].mxu1 %v3100_v2 }
 0x3a7   :  { %v3843_v0 = vpop.f32.mrb[64].mxu1 }
 0x3a8   :  { %v3844_v3 = vpop.f32.mrb[65].mxu1 }
 0x3a9   :  { %v3845_v44 = vadd.f32 %v3844_v3, %v3843_v0  ;;  %v3846_v9 = vpop.f32.mrb[66].mxu1 }
 0x3aa   :  { %v3847_v4 = vpop.f32.mrb[67].mxu1 }
 0x3ab   :  { %v3848_v34 = vadd.f32 %v3847_v4, %v3846_v9  ;;  %v3272_v21 = vadd.f32 %v3845_v44, %v6038_v35 }
 0x3ad   :  { %v6044_v8 = vsel %vm3336_vm1, %v3272_v21, -1e+30  ;;  %v3275_v31 = vadd.f32 %v3848_v34, %v6038_v35 }
 0x3ae   :  { %3353 = vmax.xlane.f32.xlu0 %v6044_v8 }
 0x3af   :  { %v3849_v16 = vpop.f32.mrb[68].mxu1  ;;  %v6050_v12 = vsel %vm3336_vm1, %v3275_v31, -1e+30 }
 0x3b0   :  { %v3850_v23 = vpop.f32.mrb[69].mxu1 }
 0x3b1   :  { %v3851_v5 = vadd.f32 %v3850_v23, %v3849_v16  ;;  %v3852_v10 = vpop.f32.mrb[70].mxu1 }
 0x3b2   :  { %v3853_v24 = vpop.f32.mrb[71].mxu1  ;;  %3355 = vmax.xlane.f32.xlu0 %v6050_v12 }
 0x3b3   :  { %v3854_v18 = vadd.f32 %v3853_v24, %v3852_v10  ;;  %v3280_v27 = vadd.f32 %v3851_v5, %v6038_v35 }
 0x3b5   :  { %v6056_v36 = vsel %vm3336_vm1, %v3280_v27, -1e+30  ;;  %v3283_v6 = vadd.f32 %v3854_v18, %v6038_v35 }
 0x3b6   :  { %3357 = vmax.xlane.f32.xlu1 %v6056_v36 }
 0x3b7   :  { %v3855_v1 = vpop.f32.mrb[72].mxu1  ;;  %v6062_v19 = vsel %vm3336_vm1, %v3283_v6, -1e+30 }
 0x3b8   :  { %v3856_v38 = vpop.f32.mrb[73].mxu1 }
 0x3b9   :  { %v3857_v53 = vadd.f32 %v3856_v38, %v3855_v1  ;;  %v3858_v20 = vpop.f32.mrb[74].mxu1 }
 0x3ba   :  { %v3859_v42 = vpop.f32.mrb[75].mxu1  ;;  %3359 = vmax.xlane.f32.xlu1 %v6062_v19 }
 0x3bb   :  { %v3860_v47 = vadd.f32 %v3859_v42, %v3858_v20  ;;  %v3288_v7 = vadd.f32 %v3857_v53, %v6038_v35 }
 0x3bd   :  { %v6068_v41 = vsel %vm3336_vm1, %v3288_v7, -1e+30  ;;  %v3291_v22 = vadd.f32 %v3860_v47, %v6038_v35 }
 0x3be   :  { %3361 = vmax.xlane.f32.xlu0 %v6068_v41 }
 0x3bf   :  { %v3861_v43 = vpop.f32.mrb[76].mxu1  ;;  %v6074_v25 = vsel %vm3336_vm1, %v3291_v22, -1e+30 }
 0x3c0   :  { %v3862_v11 = vpop.f32.mrb[77].mxu1  ;;  %3363 = vmax.xlane.f32.xlu1 %v6074_v25 }
 0x3c1   :  { %v3863_v45 = vadd.f32 %v3862_v11, %v3861_v43  ;;  %v3864_v46 = vpop.f32.mrb[78].mxu1 }
 0x3c2   :  { %v3865_v52 = vpop.f32.mrb[79].mxu1 }
 0x3c3   :  { %v3866_v29 = vadd.f32 %v3865_v52, %v3864_v46  ;;  %v3296_v48 = vadd.f32 %v3863_v45, %v6038_v35 }
 0x3c5   :  { %v6080_v49 = vsel %vm3336_vm1, %v3296_v48, -1e+30  ;;  %v3299_v50 = vadd.f32 %v3866_v29, %v6038_v35 }
 0x3c6   :  { %3365 = vmax.xlane.f32.xlu0 %v6080_v49 }
 0x3c7   :  { %v3867_v51 = vpop.f32.mrb[80].mxu1  ;;  %v6086_v55 = vsel %vm3336_vm1, %v3299_v50, -1e+30 }
 0x3c8   :  { %v3868_v26 = vpop.f32.mrb[81].mxu1  ;;  %3367 = vmax.xlane.f32.xlu1 %v6086_v55 }
 0x3c9   :  { %v3869_v56 = vadd.f32 %v3868_v26, %v3867_v51  ;;  %v3870_v54 = vpop.f32.mrb[82].mxu1 }
 0x3ca   :  { %v3871_v57 = vpop.f32.mrb[83].mxu1 }
 0x3cb   :  { %v3872_v59 = vadd.f32 %v3871_v57, %v3870_v54  ;;  %v3304_v28 = vadd.f32 %v3869_v56, %v6038_v35 }
 0x3cd   :  { %v6092_v58 = vsel %vm3336_vm1, %v3304_v28, -1e+30  ;;  %v3307_v13 = vadd.f32 %v3872_v59, %v6038_v35 }
 0x3ce   :  { %3369 = vmax.xlane.f32.xlu0 %v6092_v58 }
 0x3cf   :  { %v3873_v37 = vpop.f32.mrb[84].mxu1  ;;  %v6098_v30 = vsel %vm3336_vm1, %v3307_v13, -1e+30 }
 0x3d0   :  { %v3874_v60 = vpop.f32.mrb[85].mxu1  ;;  %3371 = vmax.xlane.f32.xlu1 %v6098_v30 }
 0x3d1   :  { %v3875_v32 = vadd.f32 %v3874_v60, %v3873_v37  ;;  %v3876_v61 = vpop.f32.mrb[86].mxu1 }
 0x3d2   :  { %v3877_v62 = vpop.f32.mrb[87].mxu1 }
 0x3d3   :  { %v3878_v14 = vadd.f32 %v3877_v62, %v3876_v61  ;;  %v3312_v63 = vadd.f32 %v3875_v32, %v6038_v35 }
 0x3d5   :  { %v6104_v39 = vsel %vm3336_vm1, %v3312_v63, -1e+30  ;;  %v3315_v40 = vadd.f32 %v3878_v14, %v6038_v35 }
 0x3d6   :  { %3373 = vmax.xlane.f32.xlu0 %v6104_v39 }
 0x3d7   :  { %v3879_v15 = vpop.f32.mrb[88].mxu1  ;;  %v6110_v2 = vsel %vm3336_vm1, %v3315_v40, -1e+30 }
 0x3d8   :  { %v3880_v17 = vpop.f32.mrb[89].mxu1  ;;  %3375 = vmax.xlane.f32.xlu1 %v6110_v2 }
 0x3d9   :  { %v3881_v0 = vadd.f32 %v3880_v17, %v3879_v15  ;;  %v3882_v3 = vpop.f32.mrb[90].mxu1 }
 0x3da   :  { %v3883_v44 = vpop.f32.mrb[91].mxu1 }
 0x3db   :  { %v3884_v9 = vadd.f32 %v3883_v44, %v3882_v3  ;;  %v3320_v4 = vadd.f32 %v3881_v0, %v6038_v35 }
 0x3dd   :  { %v6116_v34 = vsel %vm3336_vm1, %v3320_v4, -1e+30  ;;  %v3323_v21 = vadd.f32 %v3884_v9, %v6038_v35 }
 0x3de   :  { %3377 = vmax.xlane.f32.xlu0 %v6116_v34 }
 0x3df   :  { %v3885_v31 = vpop.f32.mrb[92].mxu1  ;;  %v6122_v16 = vsel %vm3336_vm1, %v3323_v21, -1e+30 }
 0x3e0   :  { %v3886_v23 = vpop.f32.mrb[93].mxu1  ;;  %3379 = vmax.xlane.f32.xlu1 %v6122_v16 }
 0x3e1   :  { %v3887_v5 = vadd.f32 %v3886_v23, %v3885_v31  ;;  %v3888_v10 = vpop.f32.mrb[94].mxu1 }
 0x3e2   :  { %v3889_v24 = vpop.f32.mrb[95].mxu1 }
 0x3e3   :  { %v3890_v18 = vadd.f32 %v3889_v24, %v3888_v10  ;;  %v3328_v27 = vadd.f32 %v3887_v5, %v6038_v35 }
 0x3e5   :  { %v6128_v6 = vsel %vm3336_vm1, %v3328_v27, -1e+30  ;;  %v3331_v1 = vadd.f32 %v3890_v18, %v6038_v35 }
 0x3e6   :  { %3381 = vmax.xlane.f32.xlu0 %v6128_v6 }
 0x3e7   :  { %v6134_v38 = vsel %vm3336_vm1, %v3331_v1, -1e+30 }
 0x3e8   :  { %3383 = vmax.xlane.f32.xlu1 %v6134_v38 }
 0x43b   :  { %v3354_v53 = vpop.xlane.xlu0 %3353 }
 0x43c   :  { %v6138_v20 = vsub.f32 %v6044_v8, %v3354_v53 }
 0x43e   :  { %v3401_v42 = vmul.f32 1.442695, %v6138_v20 }
 0x43f   :  { %v3356_v47 = vpop.xlane.xlu0 %3355 }
 0x440   :  { %4621 = vpow2.f32 %v3401_v42  ;;  %v6142_v7 = vsub.f32 %v6050_v12, %v3356_v47 }
 0x442   :  { %v3403_v35 = vmul.f32 1.442695, %v6142_v7 }
 0x443   :  { %v3358_v22 = vpop.xlane.xlu1 %3357 }
 0x444   :  { %4623 = vpow2.f32 %v3403_v35  ;;  %v6146_v33 = vsub.f32 %v6056_v36, %v3358_v22 }
 0x446   :  { %v3405_v43 = vmul.f32 1.442695, %v6146_v33 }
 0x447   :  { %v3360_v11 = vpop.xlane.xlu1 %3359 }
 0x448   :  { %4625 = vpow2.f32 %v3405_v43  ;;  %v6150_v8 = vsub.f32 %v6062_v19, %v3360_v11 }
 0x44a   :  { %v4622_v45 = vpop.eup %4621  ;;  %v3407_v46 = vmul.f32 1.442695, %v6150_v8 }
 0x44b   :  { %3433 = vadd.xlane.f32.xlu0 %v4622_v45  ;;  %v3362_v12 = vpop.xlane.xlu0 %3361 }
 0x44c   :  { %4627 = vpow2.f32 %v3407_v46  ;;  %v6154_v52 = vsub.f32 %v6068_v41, %v3362_v12 }
 0x44d   :  { %v3364_v29 = vpop.xlane.xlu1 %3363 }
 0x44e   :  { %v4624_v48 = vpop.eup %4623  ;;  %v3409_v36 = vmul.f32 1.442695, %v6154_v52  ;;  %v6158_v50 = vsub.f32 %v6074_v25, %v3364_v29 }
 0x44f   :  { %3435 = vadd.xlane.f32.xlu1 %v4624_v48 }
 0x450   :  { %4629 = vpow2.f32 %v3409_v36  ;;  %v3411_v19 = vmul.f32 1.442695, %v6158_v50 }
 0x452   :  { %v4626_v51 = vpop.eup %4625  ;;  %4631 = vpow2.f32 %v3411_v19 }
 0x453   :  { %3437 = vadd.xlane.f32.xlu0 %v4626_v51  ;;  %v3366_v26 = vpop.xlane.xlu0 %3365 }
 0x454   :  { %v6162_v56 = vsub.f32 %v6080_v49, %v3366_v26 }
 0x455   :  { %v3368_v41 = vpop.xlane.xlu1 %3367 }
 0x456   :  { %v4628_v54 = vpop.eup %4627  ;;  %v3413_v57 = vmul.f32 1.442695, %v6162_v56  ;;  %v6166_v59 = vsub.f32 %v6086_v55, %v3368_v41 }
 0x457   :  { %3439 = vadd.xlane.f32.xlu1 %v4628_v54 }
 0x458   :  { %4633 = vpow2.f32 %v3413_v57  ;;  %v3415_v25 = vmul.f32 1.442695, %v6166_v59 }
 0x45a   :  { %v4630_v28 = vpop.eup %4629  ;;  %4635 = vpow2.f32 %v3415_v25 }
 0x45b   :  { %3441 = vadd.xlane.f32.xlu0 %v4630_v28  ;;  %v3370_v13 = vpop.xlane.xlu0 %3369 }
 0x45c   :  { %v4632_v37 = vpop.eup %4631  ;;  %v6170_v60 = vsub.f32 %v6092_v58, %v3370_v13 }
 0x45d   :  { %v3372_v49 = vpop.xlane.xlu1 %3371  ;;  %3443 = vadd.xlane.f32.xlu1 %v4632_v37 }
 0x45e   :  { %v3417_v32 = vmul.f32 1.442695, %v6170_v60  ;;  %v6174_v61 = vsub.f32 %v6098_v30, %v3372_v49 }
 0x460   :  { %4637 = vpow2.f32 %v3417_v32  ;;  %v3419_v55 = vmul.f32 1.442695, %v6174_v61 }
 0x462   :  { %v4634_v62 = vpop.eup %4633  ;;  %4639 = vpow2.f32 %v3419_v55 }
 0x463   :  { %3445 = vadd.xlane.f32.xlu0 %v4634_v62  ;;  %v3374_v14 = vpop.xlane.xlu0 %3373 }
 0x464   :  { %v4636_v63 = vpop.eup %4635  ;;  %v6178_v40 = vsub.f32 %v6104_v39, %v3374_v14 }
 0x465   :  { %v3376_v58 = vpop.xlane.xlu1 %3375  ;;  %3447 = vadd.xlane.f32.xlu1 %v4636_v63 }
 0x466   :  { %v3421_v15 = vmul.f32 1.442695, %v6178_v40  ;;  %v6182_v17 = vsub.f32 %v6110_v2, %v3376_v58 }
 0x468   :  { %4641 = vpow2.f32 %v3421_v15  ;;  %v3423_v30 = vmul.f32 1.442695, %v6182_v17 }
 0x46a   :  { %v4638_v0 = vpop.eup %4637  ;;  %4643 = vpow2.f32 %v3423_v30 }
 0x46b   :  { %3449 = vadd.xlane.f32.xlu0 %v4638_v0  ;;  %v3378_v3 = vpop.xlane.xlu0 %3377 }
 0x46c   :  { %v4640_v44 = vpop.eup %4639  ;;  %v6186_v9 = vsub.f32 %v6116_v34, %v3378_v3 }
 0x46d   :  { %v3380_v39 = vpop.xlane.xlu1 %3379  ;;  %3451 = vadd.xlane.f32.xlu1 %v4640_v44 }
 0x46e   :  { %v3425_v4 = vmul.f32 1.442695, %v6186_v9  ;;  %v6190_v21 = vsub.f32 %v6122_v16, %v3380_v39 }
 0x470   :  { %4645 = vpow2.f32 %v3425_v4  ;;  %v3427_v2 = vmul.f32 1.442695, %v6190_v21 }
 0x472   :  { %v4642_v31 = vpop.eup %4641  ;;  %4647 = vpow2.f32 %v3427_v2 }
 0x473   :  { %3453 = vadd.xlane.f32.xlu0 %v4642_v31  ;;  %v3382_v23 = vpop.xlane.xlu0 %3381 }
 0x474   :  { %v4644_v5 = vpop.eup %4643  ;;  %v6194_v10 = vsub.f32 %v6128_v6, %v3382_v23 }
 0x475   :  { %v3384_v34 = vpop.xlane.xlu1 %3383  ;;  %3455 = vadd.xlane.f32.xlu1 %v4644_v5 }
 0x476   :  { %v3429_v24 = vmul.f32 1.442695, %v6194_v10  ;;  %v6198_v18 = vsub.f32 %v6134_v38, %v3384_v34 }
 0x478   :  { %4649 = vpow2.f32 %v3429_v24  ;;  %v3431_v16 = vmul.f32 1.442695, %v6198_v18 }
 0x47a   :  { %v4646_v27 = vpop.eup %4645  ;;  %4651 = vpow2.f32 %v3431_v16 }
 0x47b   :  { %3457 = vadd.xlane.f32.xlu0 %v4646_v27 }
 0x47c   :  { %v4648_v1 = vpop.eup %4647 }
 0x47d   :  { %3459 = vadd.xlane.f32.xlu1 %v4648_v1 }
 0x482   :  { %v4650_v53 = vpop.eup %4649 }
 0x483   :  { %3461 = vadd.xlane.f32.xlu0 %v4650_v53 }
 0x484   :  { %v4652_v42 = vpop.eup %4651 }
 0x485   :  { %3463 = vadd.xlane.f32.xlu1 %v4652_v42 }
 0x4d8   :  { %v3434_v6 = vpop.xlane.xlu0 %3433 }
 0x4d9   :  { %4653 = vlog2.f32 %v3434_v6 }
 0x4dc   :  { %v3436_v47 = vpop.xlane.xlu1 %3435 }
 0x4dd   :  { %4655 = vlog2.f32 %v3436_v47 }
 0x4e0   :  { %v3438_v35 = vpop.xlane.xlu0 %3437 }
 0x4e1   :  { %4657 = vlog2.f32 %v3438_v35 }
 0x4e3   :  { %v4654_v38 = vpop.eup %4653 }
 0x4e4   :  { %v3466_v22 = vmul.f32 0.6931472, %v4654_v38  ;;  %v3440_v43 = vpop.xlane.xlu1 %3439 }
 0x4e5   :  { %4659 = vlog2.f32 %v3440_v43 }
 0x4e6   :  { %v3497_v11 = vsub.f32 %v6138_v20, %v3466_v22 }
 0x4e7   :  { %v4656_v45 = vpop.eup %4655 }
 0x4e8   :  { %3513 = vst [vmem:[%s6272_s7] sm:$0xff] %v3497_v11  ;;  %v3468_v46 = vmul.f32 0.6931472, %v4656_v45  ;;  %v3442_v12 = vpop.xlane.xlu0 %3441 }
 0x4e9   :  { %4661 = vlog2.f32 %v3442_v12 }
 0x4ea   :  { %v3498_v29 = vsub.f32 %v6142_v7, %v3468_v46  ;;  %v3444_v48 = vpop.xlane.xlu1 %3443 }
 0x4eb   :  { %v4658_v36 = vpop.eup %4657  ;;  %4663 = vlog2.f32 %v3444_v48 }
 0x4ec   :  { %3514 = vst [vmem:[%s6272_s7 + $0x8] sm:$0xff] %v3498_v29  ;;  %v3470_v19 = vmul.f32 0.6931472, %v4658_v36 }
 0x4ee   :  { %v3499_v20 = vsub.f32 %v6146_v33, %v3470_v19 }
 0x4ef   :  { %v4660_v51 = vpop.eup %4659 }
 0x4f0   :  { %3515 = vst [vmem:[%s6272_s7 + $0x10] sm:$0xff] %v3499_v20  ;;  %v3472_v26 = vmul.f32 0.6931472, %v4660_v51  ;;  %v3446_v41 = vpop.xlane.xlu0 %3445 }
 0x4f1   :  { %4665 = vlog2.f32 %v3446_v41 }
 0x4f2   :  { %v3500_v7 = vsub.f32 %v6150_v8, %v3472_v26  ;;  %v3448_v54 = vpop.xlane.xlu1 %3447 }
 0x4f3   :  { %v4662_v57 = vpop.eup %4661  ;;  %4667 = vlog2.f32 %v3448_v54 }
 0x4f4   :  { %3516 = vst [vmem:[%s6272_s7 + $0x18] sm:$0xff] %v3500_v7  ;;  %v3474_v25 = vmul.f32 0.6931472, %v4662_v57 }
 0x4f5   :  { %v4664_v28 = vpop.eup %4663 }
 0x4f6   :  { %v3501_v33 = vsub.f32 %v6154_v52, %v3474_v25  ;;  %v3476_v13 = vmul.f32 0.6931472, %v4664_v28 }
 0x4f8   :  { %3517 = vst [vmem:[%s6272_s7 + $0x20] sm:$0xff] %v3501_v33  ;;  %v3502_v37 = vsub.f32 %v6158_v50, %v3476_v13  ;;  %v3450_v49 = vpop.xlane.xlu0 %3449 }
 0x4f9   :  { %4669 = vlog2.f32 %v3450_v49 }
 0x4fa   :  { %3518 = vst [vmem:[%s6272_s7 + $0x28] sm:$0xff] %v3502_v37  ;;  %v3452_v8 = vpop.xlane.xlu1 %3451 }
 0x4fb   :  { %v4666_v32 = vpop.eup %4665  ;;  %4671 = vlog2.f32 %v3452_v8 }
 0x4fc   :  { %v3478_v55 = vmul.f32 0.6931472, %v4666_v32 }
 0x4fd   :  { %v4668_v62 = vpop.eup %4667 }
 0x4fe   :  { %v3503_v52 = vsub.f32 %v6162_v56, %v3478_v55  ;;  %v3480_v14 = vmul.f32 0.6931472, %v4668_v62 }
 0x500   :  { %3519 = vst [vmem:[%s6272_s7 + $0x30] sm:$0xff] %v3503_v52  ;;  %v3504_v50 = vsub.f32 %v6166_v59, %v3480_v14  ;;  %v3454_v63 = vpop.xlane.xlu0 %3453 }
 0x501   :  { %4673 = vlog2.f32 %v3454_v63 }
 0x502   :  { %3520 = vst [vmem:[%s6272_s7 + $0x38] sm:$0xff] %v3504_v50  ;;  %v3456_v58 = vpop.xlane.xlu1 %3455 }
 0x503   :  { %v4670_v15 = vpop.eup %4669  ;;  %4675 = vlog2.f32 %v3456_v58 }
 0x504   :  { %v3482_v30 = vmul.f32 0.6931472, %v4670_v15 }
 0x505   :  { %v4672_v0 = vpop.eup %4671 }
 0x506   :  { %v3505_v56 = vsub.f32 %v6170_v60, %v3482_v30  ;;  %v3484_v3 = vmul.f32 0.6931472, %v4672_v0 }
 0x508   :  { %3521 = vst [vmem:[%s6272_s7 + $0x40] sm:$0xff] %v3505_v56  ;;  %v3506_v59 = vsub.f32 %v6174_v61, %v3484_v3  ;;  %v3458_v44 = vpop.xlane.xlu0 %3457 }
 0x509   :  { %4677 = vlog2.f32 %v3458_v44 }
 0x50a   :  { %3522 = vst [vmem:[%s6272_s7 + $0x48] sm:$0xff] %v3506_v59  ;;  %v3460_v39 = vpop.xlane.xlu1 %3459 }
 0x50b   :  { %v4674_v4 = vpop.eup %4673  ;;  %4679 = vlog2.f32 %v3460_v39 }
 0x50c   :  { %v3486_v2 = vmul.f32 0.6931472, %v4674_v4 }
 0x50d   :  { %v4676_v31 = vpop.eup %4675 }
 0x50e   :  { %v3507_v60 = vsub.f32 %v6178_v40, %v3486_v2  ;;  %v3488_v23 = vmul.f32 0.6931472, %v4676_v31 }
 0x510   :  { %3523 = vst [vmem:[%s6272_s7 + $0x50] sm:$0xff] %v3507_v60  ;;  %v3508_v61 = vsub.f32 %v6182_v17, %v3488_v23  ;;  %v3462_v5 = vpop.xlane.xlu0 %3461 }
 0x511   :  { %4681 = vlog2.f32 %v3462_v5 }
 0x512   :  { %3524 = vst [vmem:[%s6272_s7 + $0x58] sm:$0xff] %v3508_v61  ;;  %v3464_v34 = vpop.xlane.xlu1 %3463 }
 0x513   :  { %v4678_v24 = vpop.eup %4677  ;;  %4683 = vlog2.f32 %v3464_v34 }
 0x514   :  { %v3490_v16 = vmul.f32 0.6931472, %v4678_v24 }
 0x515   :  { %v4680_v27 = vpop.eup %4679 }
 0x516   :  { %v3509_v40 = vsub.f32 %v6186_v9, %v3490_v16  ;;  %v3492_v1 = vmul.f32 0.6931472, %v4680_v27 }
 0x518   :  { %3525 = vst [vmem:[%s6272_s7 + $0x60] sm:$0xff] %v3509_v40  ;;  %v3510_v17 = vsub.f32 %v6190_v21, %v3492_v1 }
 0x51a   :  { %3526 = vst [vmem:[%s6272_s7 + $0x68] sm:$0xff] %v3510_v17 }
 0x51b   :  { %v4682_v53 = vpop.eup %4681 }
 0x51c   :  { %v3494_v42 = vmul.f32 0.6931472, %v4682_v53 }
 0x51d   :  { %v4684_v6 = vpop.eup %4683 }
 0x51e   :  { %v3511_v47 = vsub.f32 %v6194_v10, %v3494_v42  ;;  %v3496_v35 = vmul.f32 0.6931472, %v4684_v6 }
 0x520   :  { %3527 = vst [vmem:[%s6272_s7 + $0x70] sm:$0xff] %v3511_v47  ;;  %v3512_v9 = vsub.f32 %v6198_v18, %v3496_v35 }
 0x522   :  { %3528 = vst [vmem:[%s6272_s7 + $0x78] sm:$0xff] %v3512_v9 }
 0x523   :  { %3533 = vsyncpa [#allocation3], 1 }

</bundles_post_ra>
